<compile_context>
chip_gen: v7x
topology: tpu7x:2x2x1
jax: 0.10.0
libtpu: 0.0.40
codegen_flags: <defaults>
</compile_context>

<pallas_src>
import jax
import jax.numpy as jnp
from jax import lax
from jax.experimental import pallas as pl
from jax.experimental.pallas import tpu as pltpu


def make_ema_kernel(cg, seq_len):
    """Build the EMA kernel for static channel count CG and sequence length L."""
    L = seq_len
    cgl = cg * L
    # Offsets into the packed f32 SMEM parameter vector.
    W1_OFF = 0                       # (CG, CG)    conv1x1 weight, (out, in)
    W3_OFF = W1_OFF + cg * cg        # (3, CG, CG) conv3x3 weight, (tap, out, in)
    B1_OFF = W3_OFF + 3 * cg * cg    # (CG,)       conv1x1 bias
    B3_OFF = B1_OFF + cg             # (CG,)       conv3x3 bias
    GNW_OFF = B3_OFF + cg            # (CG,)       GroupNorm weight
    GNB_OFF = GNW_OFF + cg           # (CG,)       GroupNorm bias
    EPS = 1e-5

    def kernel(p_ref, gx_ref, o_ref):
        x = gx_ref[...]                                       # (BT, CG*L) f32
        bt = x.shape[0]

        def w1(o, c):
            return p_ref[W1_OFF + o * cg + c]

        def w3(k, o, c):
            return p_ref[W3_OFF + (k * cg + o) * cg + c]

        # Per-channel lane-slices of the dense slab (static slices).
        xc = [x[:, c * L:(c + 1) * L] for c in range(cg)]     # (BT, L) each

        # ---- pooled mean + variance per channel (both reused by GroupNorm).
        mu = [jnp.mean(xc[c], axis=1, keepdims=True) for c in range(cg)]
        var = [jnp.mean((xc[c] - mu[c]) ** 2, axis=1, keepdims=True)
               for c in range(cg)]

        # ---- conv1x1 on the pooled length-1 signal; gate = sigmoid(hw)^2
        #      (hw.permute(0,1,2) is the identity).  CG=4 -> VPU scalar FMAs.
        gate = []
        for o in range(cg):
            hw = p_ref[B1_OFF + o]
            for c in range(cg):
                hw = hw + w1(o, c) * mu[c]                    # (BT, 1)
            s = jax.nn.sigmoid(hw)
            gate.append(s * s)

        # ---- GroupNorm(num_groups == num_channels) over L, with stat reuse:
        #      t = x*g  =>  mean(t) = g*mu_x, var(t) = g^2*var_x.
        x1 = []
        for c in range(cg):
            scale = (gate[c] * lax.rsqrt(gate[c] * gate[c] * var[c] + EPS)
                     * p_ref[GNW_OFF + c])                    # (BT, 1)
            x1.append((xc[c] - mu[c]) * scale + p_ref[GNB_OFF + c])   # (BT, L)

        # ---- conv3x3 (k=3, padding=1): shifted taps via two positive-shift
        #      lane rolls of the dense slab + per-channel boundary masks.
        pos = lax.broadcasted_iota(jnp.int32, (bt, cgl), 1) % L
        xm1_full = jnp.where(pos >= 1, pltpu.roll(x, 1, axis=1), 0.0)
        xp1_full = jnp.where(pos <= L - 2, pltpu.roll(x, cgl - 1, axis=1), 0.0)
        xm1 = [xm1_full[:, c * L:(c + 1) * L] for c in range(cg)]
        xp1 = [xp1_full[:, c * L:(c + 1) * L] for c in range(cg)]

        # Unrolled VPU tap accumulation: 3*CG*CG scalar-broadcast FMAs.
        # TODO(synk): if production CG grows to >=32, switch to a single
        # (CG, 3CG) @ (3CG, BT*L) MXU contraction instead.
        x2 = []
        for o in range(cg):
            acc = None
            for c in range(cg):
                term = (w3(0, o, c) * xm1[c] + w3(1, o, c) * xc[c]
                        + w3(2, o, c) * xp1[c])
                acc = term if acc is None else acc + term
            x2.append(acc + p_ref[B3_OFF + o])                # (BT, L)

        # ---- channel softmax of the L-pooled branch maps.
        p1 = [jnp.mean(x1[c], axis=1, keepdims=True) for c in range(cg)]
        p2 = [jnp.mean(x2[c], axis=1, keepdims=True) for c in range(cg)]

        def channel_softmax(ps):
            m = ps[0]
            for p in ps[1:]:
                m = jnp.maximum(m, p)
            es = [jnp.exp(p - m) for p in ps]
            d = es[0]
            for e in es[1:]:
                d = d + e
            return [e / d for e in es]

        a1 = channel_softmax(p1)
        a2 = channel_softmax(p2)

        # ---- cross-branch mix -> per-position gate shared by all channels.
        wmix = None
        for c in range(cg):
            term = a1[c] * x2[c] + a2[c] * x1[c]
            wmix = term if wmix is None else wmix + term      # (BT, L)
        sw = jax.nn.sigmoid(wmix)

        # ---- final gating: one lane-dense (BT, CG*L) store.
        gate_full = jnp.concatenate([sw] * cg, axis=1)        # (BT, CG*L)
        o_ref[...] = (x * gate_full).astype(o_ref.dtype)

    return kernel


def _chip_hints():
    """Return (VMEM budget for tiling, #TensorCores sharing a 'parallel' grid)."""
    vmem_bytes = 64 * 1024 * 1024          # conservative default (v7x per-TC VMEM)
    try:
        vmem_bytes = int(pltpu.get_tpu_info().vmem_capacity_bytes)
    except Exception:
        pass
    tensorcores = 1
    try:
        kind = jax.devices()[0].device_kind.lower()
        if "7" in kind:                    # v7x: two TensorCores per chip
            tensorcores = 2
    except Exception:
        pass
    # Stay well under the scoped-VMEM default and leave compiler headroom.
    budget = min(vmem_bytes // 4, 16 * 1024 * 1024)
    return budget, tensorcores


def _bg_tile(bg, cg, L, itemsize, vmem_budget, want_steps):
    """Largest legal BG tile whose padding-aware working set fits the budget,
    yielding at least `want_steps` grid steps (one per TensorCore)."""
    def lane_pad(n):
        return -(-n // 128) * 128
    # in/out slabs are double-buffered by the pipeline; ~8 live per-channel
    # (BT, L) temporaries (x_c, two shifted taps, x1, x2, ...) plus a few mix
    # buffers, all living in 128-lane-padded vregs / VMEM tiles.
    per_bg = itemsize * (4 * lane_pad(cg * L) + (8 * cg + 4) * lane_pad(L))
    max_bt = max(1, vmem_budget // per_bg)
    # Block sublane dim must be a multiple of 8 or equal to the full BG extent.
    candidates = [d for d in range(1, bg + 1)
                  if bg % d == 0 and (d % 8 == 0 or d == bg)]
    fitting = [d for d in candidates if d <= max_bt and bg // d >= want_steps]
    if fitting:
        return max(fitting)
    small = [d for d in candidates if d <= max_bt]
    return max(small) if small else min(candidates)


def ema_forward(x, params, groups=8):
    b, c, h = x.shape
    assert c % groups == 0
    cg = c // groups
    bg = b * groups
    w1, b1, w3, b3, gnw, gnb = params

    # Lane-dense slab (BG, CG*L): pure reshape, no transpose / extra HBM traffic.
    gx = x.reshape(bg, cg * h)
    # Pack all small parameters into one f32 vector -> a single tiny SMEM operand.
    packed = jnp.concatenate([
        w1.reshape(-1), w3.reshape(-1), b1.reshape(-1), b3.reshape(-1),
        gnw.reshape(-1), gnb.reshape(-1)]).astype(jnp.float32)

    vmem_budget, tensorcores = _chip_hints()
    bt = _bg_tile(bg, cg, h, jnp.dtype(x.dtype).itemsize, vmem_budget,
                  want_steps=tensorcores)
    grid = (bg // bt,)

    out = pl.pallas_call(
        make_ema_kernel(cg, h),
        out_shape=jax.ShapeDtypeStruct((bg, cg * h), x.dtype),
        grid_spec=pltpu.PrefetchScalarGridSpec(
            num_scalar_prefetch=0,
            grid=grid,
            in_specs=[
                pl.BlockSpec(memory_space=pltpu.MemorySpace.SMEM),  # packed params
                pl.BlockSpec((bt, cg * h), lambda i: (i, 0)),       # group_x slab
            ],
            out_specs=pl.BlockSpec((bt, cg * h), lambda i: (i, 0)),
        ),
        compiler_params=pltpu.CompilerParams(
            dimension_semantics=("parallel",)),
    )(packed, gx)
    return out.reshape(b, c, h)


def ema_reference(x, params, groups=8):
    """Pure-JAX mirror of the PyTorch forward, for verification."""
    w1, b1, w3, b3, gnw, gnb = params
    b, c, h = x.shape
    cg = c // groups
    hp = jax.lax.Precision.HIGHEST
    gx = x.reshape(b * groups, cg, h)
    x_h = jnp.mean(gx, axis=2, keepdims=True)
    hw = jnp.einsum('oc,bcl->bol', w1, x_h, precision=hp) + b1[None]
    s = jax.nn.sigmoid(hw)
    t = gx * s * s
    mu = jnp.mean(t, axis=2, keepdims=True)
    var = jnp.mean((t - mu) ** 2, axis=2, keepdims=True)
    x1 = (t - mu) * lax.rsqrt(var + 1e-5) * gnw[None] + gnb[None]
    xp = jnp.pad(gx, ((0, 0), (0, 0), (1, 1)))
    x2 = (jnp.einsum('oc,bcl->bol', w3[0], xp[:, :, 0:h], precision=hp)
          + jnp.einsum('oc,bcl->bol', w3[1], xp[:, :, 1:h + 1], precision=hp)
          + jnp.einsum('oc,bcl->bol', w3[2], xp[:, :, 2:h + 2], precision=hp)
          + b3[None])
    x11 = jax.nn.softmax(jnp.mean(x1, axis=2, keepdims=True), axis=1)
    x21 = jax.nn.softmax(jnp.mean(x2, axis=2, keepdims=True), axis=1)
    w = (jnp.sum(x11 * x2, axis=1, keepdims=True)
         + jnp.sum(x21 * x1, axis=1, keepdims=True))
    return (gx * jax.nn.sigmoid(w)).reshape(b, c, h)


def init_params(key, channels, groups=8):
    cg = channels // groups
    k1, k2, k3, k4, k5, k6 = jax.random.split(key, 6)
    w1 = 0.2 * jax.random.normal(k1, (cg, cg), jnp.float32)      # conv1x1 (out, in)
    b1 = 0.1 * jax.random.normal(k2, (cg, 1), jnp.float32)
    w3 = 0.2 * jax.random.normal(k3, (3, cg, cg), jnp.float32)   # conv3x3 (tap, out, in)
    b3 = 0.1 * jax.random.normal(k4, (cg, 1), jnp.float32)
    gnw = 1.0 + 0.1 * jax.random.normal(k5, (cg, 1), jnp.float32)
    gnb = 0.1 * jax.random.normal(k6, (cg, 1), jnp.float32)
    return w1, b1, w3, b3, gnw, gnb


if __name__ == "__main__":
    B, C, L = 2, 32, 64        # channels % factor(=8) == 0 -> CG = 4, BG = 16, CG*L = 256
    GROUPS = 8

    key = jax.random.PRNGKey(0)
    kx, kp = jax.random.split(key)
    x = jax.random.normal(kx, (B, C, L), jnp.float32)
    params = init_params(kp, C, GROUPS)

    out = ema_forward(x, params, GROUPS)
    out = jax.block_until_ready(out)

    ref = ema_reference(x, params, GROUPS)
    assert out.shape == (B, C, L)
    err = jnp.max(jnp.abs(out - ref))
    assert jnp.allclose(out, ref, atol=1e-4, rtol=1e-4), f"max abs err {err}"

    print("KERNEL_OK")
</pallas_src>

<mosaic_0001>
module attributes {stable_mosaic.version = 11 : i64} {
  func.func @kernel(%arg0: i32, %arg1: memref<80xf32, #tpu.memory_space<smem>>, %arg2: memref<16x256xf32, #tpu.memory_space<vmem>>, %arg3: memref<16x256xf32, #tpu.memory_space<vmem>>) attributes {dimension_semantics = [#tpu.dimension_semantics<parallel>], iteration_bounds = array<i64: 1>, scalar_prefetch = 0 : i64, scratch_operands = 0 : i64, tpu.core_type = #tpu.core_type<tc>, window_params = [{transform_indices = @transform_0, window_bounds = array<i64: 80>}, {transform_indices = @transform_1, window_bounds = array<i64: 16, 256>}, {transform_indices = @transform_2, window_bounds = array<i64: 16, 256>}]} {
    %c0 = arith.constant 0 : index
    %c0_0 = arith.constant 0 : index
    %0 = vector.load %arg2[%c0, %c0_0] : memref<16x256xf32, #tpu.memory_space<vmem>>, vector<16x256xf32>
    %1 = vector.extract_strided_slice %0 {offsets = [0, 0], sizes = [16, 64], strides = [1, 1]} : vector<16x256xf32> to vector<16x64xf32>
    %2 = vector.extract_strided_slice %0 {offsets = [0, 64], sizes = [16, 64], strides = [1, 1]} : vector<16x256xf32> to vector<16x64xf32>
    %3 = vector.extract_strided_slice %0 {offsets = [0, 128], sizes = [16, 64], strides = [1, 1]} : vector<16x256xf32> to vector<16x64xf32>
    %4 = vector.extract_strided_slice %0 {offsets = [0, 192], sizes = [16, 64], strides = [1, 1]} : vector<16x256xf32> to vector<16x64xf32>
    %cst = arith.constant dense<0.000000e+00> : vector<16xf32>
    %5 = vector.multi_reduction <add>, %1, %cst [1] : vector<16x64xf32> to vector<16xf32>
    %6 = vector.shape_cast %5 : vector<16xf32> to vector<16x1xf32>
    %cst_1 = arith.constant 6.400000e+01 : f32
    %7 = vector.broadcast %cst_1 : f32 to vector<16x1xf32>
    %8 = arith.divf %6, %7 : vector<16x1xf32>
    %cst_2 = arith.constant dense<0.000000e+00> : vector<16xf32>
    %9 = vector.multi_reduction <add>, %2, %cst_2 [1] : vector<16x64xf32> to vector<16xf32>
    %10 = vector.shape_cast %9 : vector<16xf32> to vector<16x1xf32>
    %cst_3 = arith.constant 6.400000e+01 : f32
    %11 = vector.broadcast %cst_3 : f32 to vector<16x1xf32>
    %12 = arith.divf %10, %11 : vector<16x1xf32>
    %cst_4 = arith.constant dense<0.000000e+00> : vector<16xf32>
    %13 = vector.multi_reduction <add>, %3, %cst_4 [1] : vector<16x64xf32> to vector<16xf32>
    %14 = vector.shape_cast %13 : vector<16xf32> to vector<16x1xf32>
    %cst_5 = arith.constant 6.400000e+01 : f32
    %15 = vector.broadcast %cst_5 : f32 to vector<16x1xf32>
    %16 = arith.divf %14, %15 : vector<16x1xf32>
    %cst_6 = arith.constant dense<0.000000e+00> : vector<16xf32>
    %17 = vector.multi_reduction <add>, %4, %cst_6 [1] : vector<16x64xf32> to vector<16xf32>
    %18 = vector.shape_cast %17 : vector<16xf32> to vector<16x1xf32>
    %cst_7 = arith.constant 6.400000e+01 : f32
    %19 = vector.broadcast %cst_7 : f32 to vector<16x1xf32>
    %20 = arith.divf %18, %19 : vector<16x1xf32>
    %21 = vector.broadcast %8 : vector<16x1xf32> to vector<16x64xf32>
    %22 = arith.subf %1, %21 : vector<16x64xf32>
    %23 = arith.mulf %22, %22 : vector<16x64xf32>
    %cst_8 = arith.constant dense<0.000000e+00> : vector<16xf32>
    %24 = vector.multi_reduction <add>, %23, %cst_8 [1] : vector<16x64xf32> to vector<16xf32>
    %25 = vector.shape_cast %24 : vector<16xf32> to vector<16x1xf32>
    %cst_9 = arith.constant 6.400000e+01 : f32
    %26 = vector.broadcast %cst_9 : f32 to vector<16x1xf32>
    %27 = arith.divf %25, %26 : vector<16x1xf32>
    %28 = vector.broadcast %12 : vector<16x1xf32> to vector<16x64xf32>
    %29 = arith.subf %2, %28 : vector<16x64xf32>
    %30 = arith.mulf %29, %29 : vector<16x64xf32>
    %cst_10 = arith.constant dense<0.000000e+00> : vector<16xf32>
    %31 = vector.multi_reduction <add>, %30, %cst_10 [1] : vector<16x64xf32> to vector<16xf32>
    %32 = vector.shape_cast %31 : vector<16xf32> to vector<16x1xf32>
    %cst_11 = arith.constant 6.400000e+01 : f32
    %33 = vector.broadcast %cst_11 : f32 to vector<16x1xf32>
    %34 = arith.divf %32, %33 : vector<16x1xf32>
    %35 = vector.broadcast %16 : vector<16x1xf32> to vector<16x64xf32>
    %36 = arith.subf %3, %35 : vector<16x64xf32>
    %37 = arith.mulf %36, %36 : vector<16x64xf32>
    %cst_12 = arith.constant dense<0.000000e+00> : vector<16xf32>
    %38 = vector.multi_reduction <add>, %37, %cst_12 [1] : vector<16x64xf32> to vector<16xf32>
    %39 = vector.shape_cast %38 : vector<16xf32> to vector<16x1xf32>
    %cst_13 = arith.constant 6.400000e+01 : f32
    %40 = vector.broadcast %cst_13 : f32 to vector<16x1xf32>
    %41 = arith.divf %39, %40 : vector<16x1xf32>
    %42 = vector.broadcast %20 : vector<16x1xf32> to vector<16x64xf32>
    %43 = arith.subf %4, %42 : vector<16x64xf32>
    %44 = arith.mulf %43, %43 : vector<16x64xf32>
    %cst_14 = arith.constant dense<0.000000e+00> : vector<16xf32>
    %45 = vector.multi_reduction <add>, %44, %cst_14 [1] : vector<16x64xf32> to vector<16xf32>
    %46 = vector.shape_cast %45 : vector<16xf32> to vector<16x1xf32>
    %cst_15 = arith.constant 6.400000e+01 : f32
    %47 = vector.broadcast %cst_15 : f32 to vector<16x1xf32>
    %48 = arith.divf %46, %47 : vector<16x1xf32>
    %c64 = arith.constant 64 : index
    %49 = memref.load %arg1[%c64] : memref<80xf32, #tpu.memory_space<smem>>
    %c0_16 = arith.constant 0 : index
    %50 = memref.load %arg1[%c0_16] : memref<80xf32, #tpu.memory_space<smem>>
    %51 = vector.broadcast %50 : f32 to vector<16x1xf32>
    %52 = arith.mulf %51, %8 : vector<16x1xf32>
    %53 = vector.broadcast %49 : f32 to vector<16x1xf32>
    %54 = arith.addf %53, %52 : vector<16x1xf32>
    %c1 = arith.constant 1 : index
    %55 = memref.load %arg1[%c1] : memref<80xf32, #tpu.memory_space<smem>>
    %56 = vector.broadcast %55 : f32 to vector<16x1xf32>
    %57 = arith.mulf %56, %12 : vector<16x1xf32>
    %58 = arith.addf %54, %57 : vector<16x1xf32>
    %c2 = arith.constant 2 : index
    %59 = memref.load %arg1[%c2] : memref<80xf32, #tpu.memory_space<smem>>
    %60 = vector.broadcast %59 : f32 to vector<16x1xf32>
    %61 = arith.mulf %60, %16 : vector<16x1xf32>
    %62 = arith.addf %58, %61 : vector<16x1xf32>
    %c3 = arith.constant 3 : index
    %63 = memref.load %arg1[%c3] : memref<80xf32, #tpu.memory_space<smem>>
    %64 = vector.broadcast %63 : f32 to vector<16x1xf32>
    %65 = arith.mulf %64, %20 : vector<16x1xf32>
    %66 = arith.addf %62, %65 : vector<16x1xf32>
    %67 = arith.negf %66 : vector<16x1xf32>
    %68 = math.exp %67 : vector<16x1xf32>
    %cst_17 = arith.constant 1.000000e+00 : f32
    %69 = vector.broadcast %cst_17 : f32 to vector<16x1xf32>
    %70 = arith.addf %69, %68 : vector<16x1xf32>
    %71 = arith.divf %69, %70 : vector<16x1xf32>
    %72 = arith.mulf %71, %71 : vector<16x1xf32>
    %c65 = arith.constant 65 : index
    %73 = memref.load %arg1[%c65] : memref<80xf32, #tpu.memory_space<smem>>
    %c4 = arith.constant 4 : index
    %74 = memref.load %arg1[%c4] : memref<80xf32, #tpu.memory_space<smem>>
    %75 = vector.broadcast %74 : f32 to vector<16x1xf32>
    %76 = arith.mulf %75, %8 : vector<16x1xf32>
    %77 = vector.broadcast %73 : f32 to vector<16x1xf32>
    %78 = arith.addf %77, %76 : vector<16x1xf32>
    %c5 = arith.constant 5 : index
    %79 = memref.load %arg1[%c5] : memref<80xf32, #tpu.memory_space<smem>>
    %80 = vector.broadcast %79 : f32 to vector<16x1xf32>
    %81 = arith.mulf %80, %12 : vector<16x1xf32>
    %82 = arith.addf %78, %81 : vector<16x1xf32>
    %c6 = arith.constant 6 : index
    %83 = memref.load %arg1[%c6] : memref<80xf32, #tpu.memory_space<smem>>
    %84 = vector.broadcast %83 : f32 to vector<16x1xf32>
    %85 = arith.mulf %84, %16 : vector<16x1xf32>
    %86 = arith.addf %82, %85 : vector<16x1xf32>
    %c7 = arith.constant 7 : index
    %87 = memref.load %arg1[%c7] : memref<80xf32, #tpu.memory_space<smem>>
    %88 = vector.broadcast %87 : f32 to vector<16x1xf32>
    %89 = arith.mulf %88, %20 : vector<16x1xf32>
    %90 = arith.addf %86, %89 : vector<16x1xf32>
    %91 = arith.negf %90 : vector<16x1xf32>
    %92 = math.exp %91 : vector<16x1xf32>
    %cst_18 = arith.constant 1.000000e+00 : f32
    %93 = vector.broadcast %cst_18 : f32 to vector<16x1xf32>
    %94 = arith.addf %93, %92 : vector<16x1xf32>
    %95 = arith.divf %93, %94 : vector<16x1xf32>
    %96 = arith.mulf %95, %95 : vector<16x1xf32>
    %c66 = arith.constant 66 : index
    %97 = memref.load %arg1[%c66] : memref<80xf32, #tpu.memory_space<smem>>
    %c8 = arith.constant 8 : index
    %98 = memref.load %arg1[%c8] : memref<80xf32, #tpu.memory_space<smem>>
    %99 = vector.broadcast %98 : f32 to vector<16x1xf32>
    %100 = arith.mulf %99, %8 : vector<16x1xf32>
    %101 = vector.broadcast %97 : f32 to vector<16x1xf32>
    %102 = arith.addf %101, %100 : vector<16x1xf32>
    %c9 = arith.constant 9 : index
    %103 = memref.load %arg1[%c9] : memref<80xf32, #tpu.memory_space<smem>>
    %104 = vector.broadcast %103 : f32 to vector<16x1xf32>
    %105 = arith.mulf %104, %12 : vector<16x1xf32>
    %106 = arith.addf %102, %105 : vector<16x1xf32>
    %c10 = arith.constant 10 : index
    %107 = memref.load %arg1[%c10] : memref<80xf32, #tpu.memory_space<smem>>
    %108 = vector.broadcast %107 : f32 to vector<16x1xf32>
    %109 = arith.mulf %108, %16 : vector<16x1xf32>
    %110 = arith.addf %106, %109 : vector<16x1xf32>
    %c11 = arith.constant 11 : index
    %111 = memref.load %arg1[%c11] : memref<80xf32, #tpu.memory_space<smem>>
    %112 = vector.broadcast %111 : f32 to vector<16x1xf32>
    %113 = arith.mulf %112, %20 : vector<16x1xf32>
    %114 = arith.addf %110, %113 : vector<16x1xf32>
    %115 = arith.negf %114 : vector<16x1xf32>
    %116 = math.exp %115 : vector<16x1xf32>
    %cst_19 = arith.constant 1.000000e+00 : f32
    %117 = vector.broadcast %cst_19 : f32 to vector<16x1xf32>
    %118 = arith.addf %117, %116 : vector<16x1xf32>
    %119 = arith.divf %117, %118 : vector<16x1xf32>
    %120 = arith.mulf %119, %119 : vector<16x1xf32>
    %c67 = arith.constant 67 : index
    %121 = memref.load %arg1[%c67] : memref<80xf32, #tpu.memory_space<smem>>
    %c12 = arith.constant 12 : index
    %122 = memref.load %arg1[%c12] : memref<80xf32, #tpu.memory_space<smem>>
    %123 = vector.broadcast %122 : f32 to vector<16x1xf32>
    %124 = arith.mulf %123, %8 : vector<16x1xf32>
    %125 = vector.broadcast %121 : f32 to vector<16x1xf32>
    %126 = arith.addf %125, %124 : vector<16x1xf32>
    %c13 = arith.constant 13 : index
    %127 = memref.load %arg1[%c13] : memref<80xf32, #tpu.memory_space<smem>>
    %128 = vector.broadcast %127 : f32 to vector<16x1xf32>
    %129 = arith.mulf %128, %12 : vector<16x1xf32>
    %130 = arith.addf %126, %129 : vector<16x1xf32>
    %c14 = arith.constant 14 : index
    %131 = memref.load %arg1[%c14] : memref<80xf32, #tpu.memory_space<smem>>
    %132 = vector.broadcast %131 : f32 to vector<16x1xf32>
    %133 = arith.mulf %132, %16 : vector<16x1xf32>
    %134 = arith.addf %130, %133 : vector<16x1xf32>
    %c15 = arith.constant 15 : index
    %135 = memref.load %arg1[%c15] : memref<80xf32, #tpu.memory_space<smem>>
    %136 = vector.broadcast %135 : f32 to vector<16x1xf32>
    %137 = arith.mulf %136, %20 : vector<16x1xf32>
    %138 = arith.addf %134, %137 : vector<16x1xf32>
    %139 = arith.negf %138 : vector<16x1xf32>
    %140 = math.exp %139 : vector<16x1xf32>
    %cst_20 = arith.constant 1.000000e+00 : f32
    %141 = vector.broadcast %cst_20 : f32 to vector<16x1xf32>
    %142 = arith.addf %141, %140 : vector<16x1xf32>
    %143 = arith.divf %141, %142 : vector<16x1xf32>
    %144 = arith.mulf %143, %143 : vector<16x1xf32>
    %145 = arith.mulf %72, %72 : vector<16x1xf32>
    %146 = arith.mulf %145, %27 : vector<16x1xf32>
    %cst_21 = arith.constant 9.99999974E-6 : f32
    %147 = vector.broadcast %cst_21 : f32 to vector<16x1xf32>
    %148 = arith.addf %146, %147 : vector<16x1xf32>
    %149 = math.rsqrt %148 : vector<16x1xf32>
    %150 = arith.mulf %72, %149 : vector<16x1xf32>
    %c72 = arith.constant 72 : index
    %151 = memref.load %arg1[%c72] : memref<80xf32, #tpu.memory_space<smem>>
    %152 = vector.broadcast %151 : f32 to vector<16x1xf32>
    %153 = arith.mulf %150, %152 : vector<16x1xf32>
    %154 = vector.broadcast %8 : vector<16x1xf32> to vector<16x64xf32>
    %155 = arith.subf %1, %154 : vector<16x64xf32>
    %156 = vector.broadcast %153 : vector<16x1xf32> to vector<16x64xf32>
    %157 = arith.mulf %155, %156 : vector<16x64xf32>
    %c76 = arith.constant 76 : index
    %158 = memref.load %arg1[%c76] : memref<80xf32, #tpu.memory_space<smem>>
    %159 = vector.broadcast %158 : f32 to vector<16x64xf32>
    %160 = arith.addf %157, %159 : vector<16x64xf32>
    %161 = arith.mulf %96, %96 : vector<16x1xf32>
    %162 = arith.mulf %161, %34 : vector<16x1xf32>
    %cst_22 = arith.constant 9.99999974E-6 : f32
    %163 = vector.broadcast %cst_22 : f32 to vector<16x1xf32>
    %164 = arith.addf %162, %163 : vector<16x1xf32>
    %165 = math.rsqrt %164 : vector<16x1xf32>
    %166 = arith.mulf %96, %165 : vector<16x1xf32>
    %c73 = arith.constant 73 : index
    %167 = memref.load %arg1[%c73] : memref<80xf32, #tpu.memory_space<smem>>
    %168 = vector.broadcast %167 : f32 to vector<16x1xf32>
    %169 = arith.mulf %166, %168 : vector<16x1xf32>
    %170 = vector.broadcast %12 : vector<16x1xf32> to vector<16x64xf32>
    %171 = arith.subf %2, %170 : vector<16x64xf32>
    %172 = vector.broadcast %169 : vector<16x1xf32> to vector<16x64xf32>
    %173 = arith.mulf %171, %172 : vector<16x64xf32>
    %c77 = arith.constant 77 : index
    %174 = memref.load %arg1[%c77] : memref<80xf32, #tpu.memory_space<smem>>
    %175 = vector.broadcast %174 : f32 to vector<16x64xf32>
    %176 = arith.addf %173, %175 : vector<16x64xf32>
    %177 = arith.mulf %120, %120 : vector<16x1xf32>
    %178 = arith.mulf %177, %41 : vector<16x1xf32>
    %cst_23 = arith.constant 9.99999974E-6 : f32
    %179 = vector.broadcast %cst_23 : f32 to vector<16x1xf32>
    %180 = arith.addf %178, %179 : vector<16x1xf32>
    %181 = math.rsqrt %180 : vector<16x1xf32>
    %182 = arith.mulf %120, %181 : vector<16x1xf32>
    %c74 = arith.constant 74 : index
    %183 = memref.load %arg1[%c74] : memref<80xf32, #tpu.memory_space<smem>>
    %184 = vector.broadcast %183 : f32 to vector<16x1xf32>
    %185 = arith.mulf %182, %184 : vector<16x1xf32>
    %186 = vector.broadcast %16 : vector<16x1xf32> to vector<16x64xf32>
    %187 = arith.subf %3, %186 : vector<16x64xf32>
    %188 = vector.broadcast %185 : vector<16x1xf32> to vector<16x64xf32>
    %189 = arith.mulf %187, %188 : vector<16x64xf32>
    %c78 = arith.constant 78 : index
    %190 = memref.load %arg1[%c78] : memref<80xf32, #tpu.memory_space<smem>>
    %191 = vector.broadcast %190 : f32 to vector<16x64xf32>
    %192 = arith.addf %189, %191 : vector<16x64xf32>
    %193 = arith.mulf %144, %144 : vector<16x1xf32>
    %194 = arith.mulf %193, %48 : vector<16x1xf32>
    %cst_24 = arith.constant 9.99999974E-6 : f32
    %195 = vector.broadcast %cst_24 : f32 to vector<16x1xf32>
    %196 = arith.addf %194, %195 : vector<16x1xf32>
    %197 = math.rsqrt %196 : vector<16x1xf32>
    %198 = arith.mulf %144, %197 : vector<16x1xf32>
    %c75 = arith.constant 75 : index
    %199 = memref.load %arg1[%c75] : memref<80xf32, #tpu.memory_space<smem>>
    %200 = vector.broadcast %199 : f32 to vector<16x1xf32>
    %201 = arith.mulf %198, %200 : vector<16x1xf32>
    %202 = vector.broadcast %20 : vector<16x1xf32> to vector<16x64xf32>
    %203 = arith.subf %4, %202 : vector<16x64xf32>
    %204 = vector.broadcast %201 : vector<16x1xf32> to vector<16x64xf32>
    %205 = arith.mulf %203, %204 : vector<16x64xf32>
    %c79 = arith.constant 79 : index
    %206 = memref.load %arg1[%c79] : memref<80xf32, #tpu.memory_space<smem>>
    %207 = vector.broadcast %206 : f32 to vector<16x64xf32>
    %208 = arith.addf %205, %207 : vector<16x64xf32>
    %209 = tpu.iota {dimensions = array<i32: 1>} : vector<16x256xi32>
    %c64_i32 = arith.constant 64 : i32
    %c0_i32 = arith.constant 0 : i32
    %210 = arith.cmpi eq, %c64_i32, %c0_i32 : i32
    %c1_i32 = arith.constant 1 : i32
    %211 = arith.select %210, %c1_i32, %c64_i32 : i32
    %212 = vector.broadcast %211 : i32 to vector<16x256xi32>
    %213 = arith.remsi %209, %212 : vector<16x256xi32>
    %c0_i32_25 = arith.constant 0 : i32
    %214 = vector.broadcast %c0_i32_25 : i32 to vector<16x256xi32>
    %215 = arith.cmpi ne, %213, %214 : vector<16x256xi32>
    %c0_i32_26 = arith.constant 0 : i32
    %216 = vector.broadcast %c0_i32_26 : i32 to vector<16x256xi32>
    %217 = arith.cmpi slt, %213, %216 : vector<16x256xi32>
    %c0_i32_27 = arith.constant 0 : i32
    %218 = arith.cmpi slt, %211, %c0_i32_27 : i32
    %219 = vector.broadcast %218 : i1 to vector<16x256xi1>
    %220 = vector.broadcast %219 : vector<16x256xi1> to vector<16x256xi1>
    %221 = arith.xori %217, %220 : vector<16x256xi1>
    %222 = arith.andi %221, %215 : vector<16x256xi1>
    %223 = vector.broadcast %211 : i32 to vector<16x256xi32>
    %224 = arith.addi %213, %223 : vector<16x256xi32>
    %225 = arith.select %222, %224, %213 : vector<16x256xi1>, vector<16x256xi32>
    %c1_i32_28 = arith.constant 1 : i32
    %226 = vector.broadcast %c1_i32_28 : i32 to vector<16x256xi32>
    %227 = arith.cmpi sge, %225, %226 : vector<16x256xi32>
    %c1_i32_29 = arith.constant 1 : i32
    %228 = tpu.dynamic_rotate %0 by %c1_i32_29 dim 1 : vector<16x256xf32>, i32 -> vector<16x256xf32>
    %cst_30 = arith.constant 0.000000e+00 : f32
    %229 = vector.broadcast %cst_30 : f32 to vector<16x256xf32>
    %230 = arith.select %227, %228, %229 : vector<16x256xi1>, vector<16x256xf32>
    %c62_i32 = arith.constant 62 : i32
    %231 = vector.broadcast %c62_i32 : i32 to vector<16x256xi32>
    %232 = arith.cmpi sle, %225, %231 : vector<16x256xi32>
    %c255_i32 = arith.constant 255 : i32
    %233 = tpu.dynamic_rotate %0 by %c255_i32 dim 1 : vector<16x256xf32>, i32 -> vector<16x256xf32>
    %cst_31 = arith.constant 0.000000e+00 : f32
    %234 = vector.broadcast %cst_31 : f32 to vector<16x256xf32>
    %235 = arith.select %232, %233, %234 : vector<16x256xi1>, vector<16x256xf32>
    %236 = vector.extract_strided_slice %230 {offsets = [0, 0], sizes = [16, 64], strides = [1, 1]} : vector<16x256xf32> to vector<16x64xf32>
    %237 = vector.extract_strided_slice %230 {offsets = [0, 64], sizes = [16, 64], strides = [1, 1]} : vector<16x256xf32> to vector<16x64xf32>
    %238 = vector.extract_strided_slice %230 {offsets = [0, 128], sizes = [16, 64], strides = [1, 1]} : vector<16x256xf32> to vector<16x64xf32>
    %239 = vector.extract_strided_slice %230 {offsets = [0, 192], sizes = [16, 64], strides = [1, 1]} : vector<16x256xf32> to vector<16x64xf32>
    %240 = vector.extract_strided_slice %235 {offsets = [0, 0], sizes = [16, 64], strides = [1, 1]} : vector<16x256xf32> to vector<16x64xf32>
    %241 = vector.extract_strided_slice %235 {offsets = [0, 64], sizes = [16, 64], strides = [1, 1]} : vector<16x256xf32> to vector<16x64xf32>
    %242 = vector.extract_strided_slice %235 {offsets = [0, 128], sizes = [16, 64], strides = [1, 1]} : vector<16x256xf32> to vector<16x64xf32>
    %243 = vector.extract_strided_slice %235 {offsets = [0, 192], sizes = [16, 64], strides = [1, 1]} : vector<16x256xf32> to vector<16x64xf32>
    %c16 = arith.constant 16 : index
    %244 = memref.load %arg1[%c16] : memref<80xf32, #tpu.memory_space<smem>>
    %245 = vector.broadcast %244 : f32 to vector<16x64xf32>
    %246 = arith.mulf %245, %236 : vector<16x64xf32>
    %c32 = arith.constant 32 : index
    %247 = memref.load %arg1[%c32] : memref<80xf32, #tpu.memory_space<smem>>
    %248 = vector.broadcast %247 : f32 to vector<16x64xf32>
    %249 = arith.mulf %248, %1 : vector<16x64xf32>
    %250 = arith.addf %246, %249 : vector<16x64xf32>
    %c48 = arith.constant 48 : index
    %251 = memref.load %arg1[%c48] : memref<80xf32, #tpu.memory_space<smem>>
    %252 = vector.broadcast %251 : f32 to vector<16x64xf32>
    %253 = arith.mulf %252, %240 : vector<16x64xf32>
    %254 = arith.addf %250, %253 : vector<16x64xf32>
    %c17 = arith.constant 17 : index
    %255 = memref.load %arg1[%c17] : memref<80xf32, #tpu.memory_space<smem>>
    %256 = vector.broadcast %255 : f32 to vector<16x64xf32>
    %257 = arith.mulf %256, %237 : vector<16x64xf32>
    %c33 = arith.constant 33 : index
    %258 = memref.load %arg1[%c33] : memref<80xf32, #tpu.memory_space<smem>>
    %259 = vector.broadcast %258 : f32 to vector<16x64xf32>
    %260 = arith.mulf %259, %2 : vector<16x64xf32>
    %261 = arith.addf %257, %260 : vector<16x64xf32>
    %c49 = arith.constant 49 : index
    %262 = memref.load %arg1[%c49] : memref<80xf32, #tpu.memory_space<smem>>
    %263 = vector.broadcast %262 : f32 to vector<16x64xf32>
    %264 = arith.mulf %263, %241 : vector<16x64xf32>
    %265 = arith.addf %261, %264 : vector<16x64xf32>
    %266 = arith.addf %254, %265 : vector<16x64xf32>
    %c18 = arith.constant 18 : index
    %267 = memref.load %arg1[%c18] : memref<80xf32, #tpu.memory_space<smem>>
    %268 = vector.broadcast %267 : f32 to vector<16x64xf32>
    %269 = arith.mulf %268, %238 : vector<16x64xf32>
    %c34 = arith.constant 34 : index
    %270 = memref.load %arg1[%c34] : memref<80xf32, #tpu.memory_space<smem>>
    %271 = vector.broadcast %270 : f32 to vector<16x64xf32>
    %272 = arith.mulf %271, %3 : vector<16x64xf32>
    %273 = arith.addf %269, %272 : vector<16x64xf32>
    %c50 = arith.constant 50 : index
    %274 = memref.load %arg1[%c50] : memref<80xf32, #tpu.memory_space<smem>>
    %275 = vector.broadcast %274 : f32 to vector<16x64xf32>
    %276 = arith.mulf %275, %242 : vector<16x64xf32>
    %277 = arith.addf %273, %276 : vector<16x64xf32>
    %278 = arith.addf %266, %277 : vector<16x64xf32>
    %c19 = arith.constant 19 : index
    %279 = memref.load %arg1[%c19] : memref<80xf32, #tpu.memory_space<smem>>
    %280 = vector.broadcast %279 : f32 to vector<16x64xf32>
    %281 = arith.mulf %280, %239 : vector<16x64xf32>
    %c35 = arith.constant 35 : index
    %282 = memref.load %arg1[%c35] : memref<80xf32, #tpu.memory_space<smem>>
    %283 = vector.broadcast %282 : f32 to vector<16x64xf32>
    %284 = arith.mulf %283, %4 : vector<16x64xf32>
    %285 = arith.addf %281, %284 : vector<16x64xf32>
    %c51 = arith.constant 51 : index
    %286 = memref.load %arg1[%c51] : memref<80xf32, #tpu.memory_space<smem>>
    %287 = vector.broadcast %286 : f32 to vector<16x64xf32>
    %288 = arith.mulf %287, %243 : vector<16x64xf32>
    %289 = arith.addf %285, %288 : vector<16x64xf32>
    %290 = arith.addf %278, %289 : vector<16x64xf32>
    %c68 = arith.constant 68 : index
    %291 = memref.load %arg1[%c68] : memref<80xf32, #tpu.memory_space<smem>>
    %292 = vector.broadcast %291 : f32 to vector<16x64xf32>
    %293 = arith.addf %290, %292 : vector<16x64xf32>
    %c20 = arith.constant 20 : index
    %294 = memref.load %arg1[%c20] : memref<80xf32, #tpu.memory_space<smem>>
    %295 = vector.broadcast %294 : f32 to vector<16x64xf32>
    %296 = arith.mulf %295, %236 : vector<16x64xf32>
    %c36 = arith.constant 36 : index
    %297 = memref.load %arg1[%c36] : memref<80xf32, #tpu.memory_space<smem>>
    %298 = vector.broadcast %297 : f32 to vector<16x64xf32>
    %299 = arith.mulf %298, %1 : vector<16x64xf32>
    %300 = arith.addf %296, %299 : vector<16x64xf32>
    %c52 = arith.constant 52 : index
    %301 = memref.load %arg1[%c52] : memref<80xf32, #tpu.memory_space<smem>>
    %302 = vector.broadcast %301 : f32 to vector<16x64xf32>
    %303 = arith.mulf %302, %240 : vector<16x64xf32>
    %304 = arith.addf %300, %303 : vector<16x64xf32>
    %c21 = arith.constant 21 : index
    %305 = memref.load %arg1[%c21] : memref<80xf32, #tpu.memory_space<smem>>
    %306 = vector.broadcast %305 : f32 to vector<16x64xf32>
    %307 = arith.mulf %306, %237 : vector<16x64xf32>
    %c37 = arith.constant 37 : index
    %308 = memref.load %arg1[%c37] : memref<80xf32, #tpu.memory_space<smem>>
    %309 = vector.broadcast %308 : f32 to vector<16x64xf32>
    %310 = arith.mulf %309, %2 : vector<16x64xf32>
    %311 = arith.addf %307, %310 : vector<16x64xf32>
    %c53 = arith.constant 53 : index
    %312 = memref.load %arg1[%c53] : memref<80xf32, #tpu.memory_space<smem>>
    %313 = vector.broadcast %312 : f32 to vector<16x64xf32>
    %314 = arith.mulf %313, %241 : vector<16x64xf32>
    %315 = arith.addf %311, %314 : vector<16x64xf32>
    %316 = arith.addf %304, %315 : vector<16x64xf32>
    %c22 = arith.constant 22 : index
    %317 = memref.load %arg1[%c22] : memref<80xf32, #tpu.memory_space<smem>>
    %318 = vector.broadcast %317 : f32 to vector<16x64xf32>
    %319 = arith.mulf %318, %238 : vector<16x64xf32>
    %c38 = arith.constant 38 : index
    %320 = memref.load %arg1[%c38] : memref<80xf32, #tpu.memory_space<smem>>
    %321 = vector.broadcast %320 : f32 to vector<16x64xf32>
    %322 = arith.mulf %321, %3 : vector<16x64xf32>
    %323 = arith.addf %319, %322 : vector<16x64xf32>
    %c54 = arith.constant 54 : index
    %324 = memref.load %arg1[%c54] : memref<80xf32, #tpu.memory_space<smem>>
    %325 = vector.broadcast %324 : f32 to vector<16x64xf32>
    %326 = arith.mulf %325, %242 : vector<16x64xf32>
    %327 = arith.addf %323, %326 : vector<16x64xf32>
    %328 = arith.addf %316, %327 : vector<16x64xf32>
    %c23 = arith.constant 23 : index
    %329 = memref.load %arg1[%c23] : memref<80xf32, #tpu.memory_space<smem>>
    %330 = vector.broadcast %329 : f32 to vector<16x64xf32>
    %331 = arith.mulf %330, %239 : vector<16x64xf32>
    %c39 = arith.constant 39 : index
    %332 = memref.load %arg1[%c39] : memref<80xf32, #tpu.memory_space<smem>>
    %333 = vector.broadcast %332 : f32 to vector<16x64xf32>
    %334 = arith.mulf %333, %4 : vector<16x64xf32>
    %335 = arith.addf %331, %334 : vector<16x64xf32>
    %c55 = arith.constant 55 : index
    %336 = memref.load %arg1[%c55] : memref<80xf32, #tpu.memory_space<smem>>
    %337 = vector.broadcast %336 : f32 to vector<16x64xf32>
    %338 = arith.mulf %337, %243 : vector<16x64xf32>
    %339 = arith.addf %335, %338 : vector<16x64xf32>
    %340 = arith.addf %328, %339 : vector<16x64xf32>
    %c69 = arith.constant 69 : index
    %341 = memref.load %arg1[%c69] : memref<80xf32, #tpu.memory_space<smem>>
    %342 = vector.broadcast %341 : f32 to vector<16x64xf32>
    %343 = arith.addf %340, %342 : vector<16x64xf32>
    %c24 = arith.constant 24 : index
    %344 = memref.load %arg1[%c24] : memref<80xf32, #tpu.memory_space<smem>>
    %345 = vector.broadcast %344 : f32 to vector<16x64xf32>
    %346 = arith.mulf %345, %236 : vector<16x64xf32>
    %c40 = arith.constant 40 : index
    %347 = memref.load %arg1[%c40] : memref<80xf32, #tpu.memory_space<smem>>
    %348 = vector.broadcast %347 : f32 to vector<16x64xf32>
    %349 = arith.mulf %348, %1 : vector<16x64xf32>
    %350 = arith.addf %346, %349 : vector<16x64xf32>
    %c56 = arith.constant 56 : index
    %351 = memref.load %arg1[%c56] : memref<80xf32, #tpu.memory_space<smem>>
    %352 = vector.broadcast %351 : f32 to vector<16x64xf32>
    %353 = arith.mulf %352, %240 : vector<16x64xf32>
    %354 = arith.addf %350, %353 : vector<16x64xf32>
    %c25 = arith.constant 25 : index
    %355 = memref.load %arg1[%c25] : memref<80xf32, #tpu.memory_space<smem>>
    %356 = vector.broadcast %355 : f32 to vector<16x64xf32>
    %357 = arith.mulf %356, %237 : vector<16x64xf32>
    %c41 = arith.constant 41 : index
    %358 = memref.load %arg1[%c41] : memref<80xf32, #tpu.memory_space<smem>>
    %359 = vector.broadcast %358 : f32 to vector<16x64xf32>
    %360 = arith.mulf %359, %2 : vector<16x64xf32>
    %361 = arith.addf %357, %360 : vector<16x64xf32>
    %c57 = arith.constant 57 : index
    %362 = memref.load %arg1[%c57] : memref<80xf32, #tpu.memory_space<smem>>
    %363 = vector.broadcast %362 : f32 to vector<16x64xf32>
    %364 = arith.mulf %363, %241 : vector<16x64xf32>
    %365 = arith.addf %361, %364 : vector<16x64xf32>
    %366 = arith.addf %354, %365 : vector<16x64xf32>
    %c26 = arith.constant 26 : index
    %367 = memref.load %arg1[%c26] : memref<80xf32, #tpu.memory_space<smem>>
    %368 = vector.broadcast %367 : f32 to vector<16x64xf32>
    %369 = arith.mulf %368, %238 : vector<16x64xf32>
    %c42 = arith.constant 42 : index
    %370 = memref.load %arg1[%c42] : memref<80xf32, #tpu.memory_space<smem>>
    %371 = vector.broadcast %370 : f32 to vector<16x64xf32>
    %372 = arith.mulf %371, %3 : vector<16x64xf32>
    %373 = arith.addf %369, %372 : vector<16x64xf32>
    %c58 = arith.constant 58 : index
    %374 = memref.load %arg1[%c58] : memref<80xf32, #tpu.memory_space<smem>>
    %375 = vector.broadcast %374 : f32 to vector<16x64xf32>
    %376 = arith.mulf %375, %242 : vector<16x64xf32>
    %377 = arith.addf %373, %376 : vector<16x64xf32>
    %378 = arith.addf %366, %377 : vector<16x64xf32>
    %c27 = arith.constant 27 : index
    %379 = memref.load %arg1[%c27] : memref<80xf32, #tpu.memory_space<smem>>
    %380 = vector.broadcast %379 : f32 to vector<16x64xf32>
    %381 = arith.mulf %380, %239 : vector<16x64xf32>
    %c43 = arith.constant 43 : index
    %382 = memref.load %arg1[%c43] : memref<80xf32, #tpu.memory_space<smem>>
    %383 = vector.broadcast %382 : f32 to vector<16x64xf32>
    %384 = arith.mulf %383, %4 : vector<16x64xf32>
    %385 = arith.addf %381, %384 : vector<16x64xf32>
    %c59 = arith.constant 59 : index
    %386 = memref.load %arg1[%c59] : memref<80xf32, #tpu.memory_space<smem>>
    %387 = vector.broadcast %386 : f32 to vector<16x64xf32>
    %388 = arith.mulf %387, %243 : vector<16x64xf32>
    %389 = arith.addf %385, %388 : vector<16x64xf32>
    %390 = arith.addf %378, %389 : vector<16x64xf32>
    %c70 = arith.constant 70 : index
    %391 = memref.load %arg1[%c70] : memref<80xf32, #tpu.memory_space<smem>>
    %392 = vector.broadcast %391 : f32 to vector<16x64xf32>
    %393 = arith.addf %390, %392 : vector<16x64xf32>
    %c28 = arith.constant 28 : index
    %394 = memref.load %arg1[%c28] : memref<80xf32, #tpu.memory_space<smem>>
    %395 = vector.broadcast %394 : f32 to vector<16x64xf32>
    %396 = arith.mulf %395, %236 : vector<16x64xf32>
    %c44 = arith.constant 44 : index
    %397 = memref.load %arg1[%c44] : memref<80xf32, #tpu.memory_space<smem>>
    %398 = vector.broadcast %397 : f32 to vector<16x64xf32>
    %399 = arith.mulf %398, %1 : vector<16x64xf32>
    %400 = arith.addf %396, %399 : vector<16x64xf32>
    %c60 = arith.constant 60 : index
    %401 = memref.load %arg1[%c60] : memref<80xf32, #tpu.memory_space<smem>>
    %402 = vector.broadcast %401 : f32 to vector<16x64xf32>
    %403 = arith.mulf %402, %240 : vector<16x64xf32>
    %404 = arith.addf %400, %403 : vector<16x64xf32>
    %c29 = arith.constant 29 : index
    %405 = memref.load %arg1[%c29] : memref<80xf32, #tpu.memory_space<smem>>
    %406 = vector.broadcast %405 : f32 to vector<16x64xf32>
    %407 = arith.mulf %406, %237 : vector<16x64xf32>
    %c45 = arith.constant 45 : index
    %408 = memref.load %arg1[%c45] : memref<80xf32, #tpu.memory_space<smem>>
    %409 = vector.broadcast %408 : f32 to vector<16x64xf32>
    %410 = arith.mulf %409, %2 : vector<16x64xf32>
    %411 = arith.addf %407, %410 : vector<16x64xf32>
    %c61 = arith.constant 61 : index
    %412 = memref.load %arg1[%c61] : memref<80xf32, #tpu.memory_space<smem>>
    %413 = vector.broadcast %412 : f32 to vector<16x64xf32>
    %414 = arith.mulf %413, %241 : vector<16x64xf32>
    %415 = arith.addf %411, %414 : vector<16x64xf32>
    %416 = arith.addf %404, %415 : vector<16x64xf32>
    %c30 = arith.constant 30 : index
    %417 = memref.load %arg1[%c30] : memref<80xf32, #tpu.memory_space<smem>>
    %418 = vector.broadcast %417 : f32 to vector<16x64xf32>
    %419 = arith.mulf %418, %238 : vector<16x64xf32>
    %c46 = arith.constant 46 : index
    %420 = memref.load %arg1[%c46] : memref<80xf32, #tpu.memory_space<smem>>
    %421 = vector.broadcast %420 : f32 to vector<16x64xf32>
    %422 = arith.mulf %421, %3 : vector<16x64xf32>
    %423 = arith.addf %419, %422 : vector<16x64xf32>
    %c62 = arith.constant 62 : index
    %424 = memref.load %arg1[%c62] : memref<80xf32, #tpu.memory_space<smem>>
    %425 = vector.broadcast %424 : f32 to vector<16x64xf32>
    %426 = arith.mulf %425, %242 : vector<16x64xf32>
    %427 = arith.addf %423, %426 : vector<16x64xf32>
    %428 = arith.addf %416, %427 : vector<16x64xf32>
    %c31 = arith.constant 31 : index
    %429 = memref.load %arg1[%c31] : memref<80xf32, #tpu.memory_space<smem>>
    %430 = vector.broadcast %429 : f32 to vector<16x64xf32>
    %431 = arith.mulf %430, %239 : vector<16x64xf32>
    %c47 = arith.constant 47 : index
    %432 = memref.load %arg1[%c47] : memref<80xf32, #tpu.memory_space<smem>>
    %433 = vector.broadcast %432 : f32 to vector<16x64xf32>
    %434 = arith.mulf %433, %4 : vector<16x64xf32>
    %435 = arith.addf %431, %434 : vector<16x64xf32>
    %c63 = arith.constant 63 : index
    %436 = memref.load %arg1[%c63] : memref<80xf32, #tpu.memory_space<smem>>
    %437 = vector.broadcast %436 : f32 to vector<16x64xf32>
    %438 = arith.mulf %437, %243 : vector<16x64xf32>
    %439 = arith.addf %435, %438 : vector<16x64xf32>
    %440 = arith.addf %428, %439 : vector<16x64xf32>
    %c71 = arith.constant 71 : index
    %441 = memref.load %arg1[%c71] : memref<80xf32, #tpu.memory_space<smem>>
    %442 = vector.broadcast %441 : f32 to vector<16x64xf32>
    %443 = arith.addf %440, %442 : vector<16x64xf32>
    %cst_32 = arith.constant dense<0.000000e+00> : vector<16xf32>
    %444 = vector.multi_reduction <add>, %160, %cst_32 [1] : vector<16x64xf32> to vector<16xf32>
    %445 = vector.shape_cast %444 : vector<16xf32> to vector<16x1xf32>
    %cst_33 = arith.constant 6.400000e+01 : f32
    %446 = vector.broadcast %cst_33 : f32 to vector<16x1xf32>
    %447 = arith.divf %445, %446 : vector<16x1xf32>
    %cst_34 = arith.constant dense<0.000000e+00> : vector<16xf32>
    %448 = vector.multi_reduction <add>, %176, %cst_34 [1] : vector<16x64xf32> to vector<16xf32>
    %449 = vector.shape_cast %448 : vector<16xf32> to vector<16x1xf32>
    %cst_35 = arith.constant 6.400000e+01 : f32
    %450 = vector.broadcast %cst_35 : f32 to vector<16x1xf32>
    %451 = arith.divf %449, %450 : vector<16x1xf32>
    %cst_36 = arith.constant dense<0.000000e+00> : vector<16xf32>
    %452 = vector.multi_reduction <add>, %192, %cst_36 [1] : vector<16x64xf32> to vector<16xf32>
    %453 = vector.shape_cast %452 : vector<16xf32> to vector<16x1xf32>
    %cst_37 = arith.constant 6.400000e+01 : f32
    %454 = vector.broadcast %cst_37 : f32 to vector<16x1xf32>
    %455 = arith.divf %453, %454 : vector<16x1xf32>
    %cst_38 = arith.constant dense<0.000000e+00> : vector<16xf32>
    %456 = vector.multi_reduction <add>, %208, %cst_38 [1] : vector<16x64xf32> to vector<16xf32>
    %457 = vector.shape_cast %456 : vector<16xf32> to vector<16x1xf32>
    %cst_39 = arith.constant 6.400000e+01 : f32
    %458 = vector.broadcast %cst_39 : f32 to vector<16x1xf32>
    %459 = arith.divf %457, %458 : vector<16x1xf32>
    %cst_40 = arith.constant dense<0.000000e+00> : vector<16xf32>
    %460 = vector.multi_reduction <add>, %293, %cst_40 [1] : vector<16x64xf32> to vector<16xf32>
    %461 = vector.shape_cast %460 : vector<16xf32> to vector<16x1xf32>
    %cst_41 = arith.constant 6.400000e+01 : f32
    %462 = vector.broadcast %cst_41 : f32 to vector<16x1xf32>
    %463 = arith.divf %461, %462 : vector<16x1xf32>
    %cst_42 = arith.constant dense<0.000000e+00> : vector<16xf32>
    %464 = vector.multi_reduction <add>, %343, %cst_42 [1] : vector<16x64xf32> to vector<16xf32>
    %465 = vector.shape_cast %464 : vector<16xf32> to vector<16x1xf32>
    %cst_43 = arith.constant 6.400000e+01 : f32
    %466 = vector.broadcast %cst_43 : f32 to vector<16x1xf32>
    %467 = arith.divf %465, %466 : vector<16x1xf32>
    %cst_44 = arith.constant dense<0.000000e+00> : vector<16xf32>
    %468 = vector.multi_reduction <add>, %393, %cst_44 [1] : vector<16x64xf32> to vector<16xf32>
    %469 = vector.shape_cast %468 : vector<16xf32> to vector<16x1xf32>
    %cst_45 = arith.constant 6.400000e+01 : f32
    %470 = vector.broadcast %cst_45 : f32 to vector<16x1xf32>
    %471 = arith.divf %469, %470 : vector<16x1xf32>
    %cst_46 = arith.constant dense<0.000000e+00> : vector<16xf32>
    %472 = vector.multi_reduction <add>, %443, %cst_46 [1] : vector<16x64xf32> to vector<16xf32>
    %473 = vector.shape_cast %472 : vector<16xf32> to vector<16x1xf32>
    %cst_47 = arith.constant 6.400000e+01 : f32
    %474 = vector.broadcast %cst_47 : f32 to vector<16x1xf32>
    %475 = arith.divf %473, %474 : vector<16x1xf32>
    %476 = arith.maximumf %447, %451 : vector<16x1xf32>
    %477 = arith.maximumf %476, %455 : vector<16x1xf32>
    %478 = arith.maximumf %477, %459 : vector<16x1xf32>
    %479 = arith.subf %447, %478 : vector<16x1xf32>
    %480 = math.exp %479 : vector<16x1xf32>
    %481 = arith.subf %451, %478 : vector<16x1xf32>
    %482 = math.exp %481 : vector<16x1xf32>
    %483 = arith.subf %455, %478 : vector<16x1xf32>
    %484 = math.exp %483 : vector<16x1xf32>
    %485 = arith.subf %459, %478 : vector<16x1xf32>
    %486 = math.exp %485 : vector<16x1xf32>
    %487 = arith.addf %480, %482 : vector<16x1xf32>
    %488 = arith.addf %487, %484 : vector<16x1xf32>
    %489 = arith.addf %488, %486 : vector<16x1xf32>
    %490 = arith.divf %480, %489 : vector<16x1xf32>
    %491 = arith.divf %482, %489 : vector<16x1xf32>
    %492 = arith.divf %484, %489 : vector<16x1xf32>
    %493 = arith.divf %486, %489 : vector<16x1xf32>
    %494 = arith.maximumf %463, %467 : vector<16x1xf32>
    %495 = arith.maximumf %494, %471 : vector<16x1xf32>
    %496 = arith.maximumf %495, %475 : vector<16x1xf32>
    %497 = arith.subf %463, %496 : vector<16x1xf32>
    %498 = math.exp %497 : vector<16x1xf32>
    %499 = arith.subf %467, %496 : vector<16x1xf32>
    %500 = math.exp %499 : vector<16x1xf32>
    %501 = arith.subf %471, %496 : vector<16x1xf32>
    %502 = math.exp %501 : vector<16x1xf32>
    %503 = arith.subf %475, %496 : vector<16x1xf32>
    %504 = math.exp %503 : vector<16x1xf32>
    %505 = arith.addf %498, %500 : vector<16x1xf32>
    %506 = arith.addf %505, %502 : vector<16x1xf32>
    %507 = arith.addf %506, %504 : vector<16x1xf32>
    %508 = arith.divf %498, %507 : vector<16x1xf32>
    %509 = arith.divf %500, %507 : vector<16x1xf32>
    %510 = arith.divf %502, %507 : vector<16x1xf32>
    %511 = arith.divf %504, %507 : vector<16x1xf32>
    %512 = vector.broadcast %490 : vector<16x1xf32> to vector<16x64xf32>
    %513 = arith.mulf %512, %293 : vector<16x64xf32>
    %514 = vector.broadcast %508 : vector<16x1xf32> to vector<16x64xf32>
    %515 = arith.mulf %514, %160 : vector<16x64xf32>
    %516 = arith.addf %513, %515 : vector<16x64xf32>
    %517 = vector.broadcast %491 : vector<16x1xf32> to vector<16x64xf32>
    %518 = arith.mulf %517, %343 : vector<16x64xf32>
    %519 = vector.broadcast %509 : vector<16x1xf32> to vector<16x64xf32>
    %520 = arith.mulf %519, %176 : vector<16x64xf32>
    %521 = arith.addf %518, %520 : vector<16x64xf32>
    %522 = arith.addf %516, %521 : vector<16x64xf32>
    %523 = vector.broadcast %492 : vector<16x1xf32> to vector<16x64xf32>
    %524 = arith.mulf %523, %393 : vector<16x64xf32>
    %525 = vector.broadcast %510 : vector<16x1xf32> to vector<16x64xf32>
    %526 = arith.mulf %525, %192 : vector<16x64xf32>
    %527 = arith.addf %524, %526 : vector<16x64xf32>
    %528 = arith.addf %522, %527 : vector<16x64xf32>
    %529 = vector.broadcast %493 : vector<16x1xf32> to vector<16x64xf32>
    %530 = arith.mulf %529, %443 : vector<16x64xf32>
    %531 = vector.broadcast %511 : vector<16x1xf32> to vector<16x64xf32>
    %532 = arith.mulf %531, %208 : vector<16x64xf32>
    %533 = arith.addf %530, %532 : vector<16x64xf32>
    %534 = arith.addf %528, %533 : vector<16x64xf32>
    %535 = arith.negf %534 : vector<16x64xf32>
    %536 = math.exp %535 : vector<16x64xf32>
    %cst_48 = arith.constant 1.000000e+00 : f32
    %537 = vector.broadcast %cst_48 : f32 to vector<16x64xf32>
    %538 = arith.addf %537, %536 : vector<16x64xf32>
    %539 = arith.divf %537, %538 : vector<16x64xf32>
    %540 = tpu.concatenate %539, %539, %539, %539 in 1 : vector<16x64xf32>, vector<16x64xf32>, vector<16x64xf32>, vector<16x64xf32> -> vector<16x256xf32>
    %541 = arith.mulf %0, %540 : vector<16x256xf32>
    %c0_49 = arith.constant 0 : index
    %c0_50 = arith.constant 0 : index
    %542 = vector.load %arg3[%c0_49, %c0_50] : memref<16x256xf32, #tpu.memory_space<vmem>>, vector<16x256xf32>
    tpu.vector_store %arg3[%c0_49, %c0_50], %541 {strides = array<i32>} : memref<16x256xf32, #tpu.memory_space<vmem>>, vector<16x256xf32>,
    return
  }
  func.func @transform_0(%arg0: i32) -> i32 {
    %c0_i32 = arith.constant 0 : i32
    %c0_i32_0 = arith.constant 0 : i32
    return %c0_i32 : i32
  }
  func.func @transform_1(%arg0: i32) -> (i32, i32) {
    %c0_i32 = arith.constant 0 : i32
    %c0_i32_0 = arith.constant 0 : i32
    return %arg0, %c0_i32 : i32, i32
  }
  func.func @transform_2(%arg0: i32) -> (i32, i32) {
    %c0_i32 = arith.constant 0 : i32
    %c0_i32_0 = arith.constant 0 : i32
    return %arg0, %c0_i32 : i32, i32
  }
}

</mosaic_0001>

<bundles_post_ra>
// kernel: tpu_custom_call.1
= control target key start
LH: loop header
LB: loop body
LE: loop exit
PB: predicated region body
PF: predicated region fallthrough
CT: control target
= control target key end

     0   :  { %s2567_s0 = inlined_call_operand.hbm [shape: f32[80], index: 0, kind: input, shape index: {}]   ;;  %s2568_s1 = inlined_call_operand.hbm [shape: f32[16,256], index: 1, kind: input, shape index: {}]   ;;  %s2569_s2 = inlined_call_operand.hbm [shape: f32[16,256], index: 2, kind: output, shape index: {}]  }
   0x1   :  { %2648 = sst [smem:[#allocation63_spill]] %s2569_s2 }
   0x2   :  { %7 = vsyncpa [#allocation5], 0 }
   0x3   :  { %8 = vsyncpa [#allocation3], 0 }
   0x4   :  { %9 = vsyncpa [#allocation4], 0  ;;  %s1283_s11 = scalar_lea.hbm %s2567_s0, 16 }
   0x5   :  { %p1284_p0 = scmp.ne.s32.totalorder %s2567_s0, %s1283_s11  ;;  %p1287_p1 = scmp.lt.u32.totalorder %s1283_s11, %s2567_s0 }
   0x7   :  { %p1289_p2 = pnand %p1287_p1, %p1284_p0 }
   0x9   :  { %1292 = shalt.err (!%p1289_p2)
}
   0xa   :  { %s1343_s16 = smov [#allocation2]   ;;  %s1344_s19 = smov [#allocation6]  }
   0xb   :  { %17 = dma.hbm_to_smem %s2567_s0, 16, %s1343_s16, [#allocation5]  }
   0xc   :  { %s23_s20 = sshll.u32 %s1344_s19, 4  ;;  %s1293_s23 = scalar_lea.hbm %s2568_s1, 512  ;;  %s24_s20 = int_to_ptr.vmem [resolvable:$true] %s23_s20 }
   0xd   :  { %p1294_p3 = scmp.ne.s32.totalorder %s2568_s1, %s1293_s23  ;;  %p1297_p4 = scmp.lt.u32.totalorder %s1293_s23, %s2568_s1 }
   0xf   :  { %p1299_p5 = pnand %p1297_p4, %p1294_p3 }
  0x11   :  { %1302 = shalt.err (!%p1299_p5)
}
  0x12   :  { %s1303_s28 = scalar_lea.vmem %s24_s20, 512  ;;  %p1308_p7 = scmp.lt.s32.totalorder %s24_s20, %s24_s20 }
  0x13   :  { %p1304_p6 = scmp.ne.s32.totalorder %s24_s20, %s1303_s28  ;;  %p1309_p8 = scmp.lt.s32.totalorder %s1303_s28, %s1303_s28 }
  0x15   :  { %p1310_p9 = por %p1309_p8, %p1308_p7 }
  0x17   :  { %p1311_p10 = pnand %p1310_p9, %p1304_p6 }
  0x19   :  { %1314 = shalt.err (!%p1311_p10)
}
  0x1a   :  { %s2570_s0 = smov 256   ;;  %s2571_s29 = smov 16  }
  0x1b   :  { %29 = dma.hbm_to_vmem [thread:$0]  %s2568_s1, 512, %s24_s20, [#allocation3], %s2570_s0, %s2570_s0, %s2571_s29  }
  0x1c   :  { %1337 = dma.done.wait [#allocation5], 16  }
  0x1d   :  { %1338 = vsyncadd [#allocation5], 4294967280 }
  0x1e   :  { %1339 = dma.done.wait [#allocation3], 512  }
  0x1f   :  { %1340 = vsyncadd [#allocation3], 4294966784 }
  0x20   :  { %36 = sfence }
  0x21   :  { %v1393_v0 = vld [vmem:[#allocation6] sm:$0xff]  ;;  %v1395_v1 = vld [vmem:[#allocation6 + $0x8] sm:$0xff]  ;;  %s2572_s4 = smov 64   ;;  %v1401_v2 = vld [vmem:[#allocation6 + $0x10] sm:$0xff]  ;;  %vm41_vm0 = vcmask 523264   ;;  %s1348_s1 = smov 1   ;;  %v395_v16 = vlaneseq }
  0x22   :  { %53 = vrot.lane.b32.xlu0 %v1393_v0, %s2572_s4  ;;  %77 = vrot.lane.b32.xlu1 %v1395_v1, %s2572_s4  ;;  %v1403_v3 = vld [vmem:[#allocation6 + $0x18] sm:$0xff]  ;;  %v42_v4 = vsel %vm41_vm0, %v1393_v0, 0.0  ;;  %v45_v12 = vsel %vm41_vm0, %v1401_v2, 0.0  ;;  %v67_v14 = vsel %vm41_vm0, %v1395_v1, 0.0  ;;  %s1349_s5 = smov 127   ;;  %s1429_s6 = sld [smem:[#allocation2 + $0x40]] }
  0x23   :  { %2649 = vst [vmem:[#allocation11_spill] sm:$0xff] %v1403_v3  ;;  %v70_v15 = vsel %vm41_vm0, %v1403_v3, 0.0  ;;  %s1431_s7 = sld [smem:[#allocation2]]  ;;  %s1433_s8 = sld [smem:[#allocation2 + $0x41]]  ;;  %v1473_v17 = vand.u32 127, %v395_v16 }
  0x24   :  { %s1435_s9 = sld [smem:[#allocation2 + $0x4]]  ;;  %s1437_s10 = sld [smem:[#allocation2 + $0x42]] }
  0x25   :  { %s1439_s11 = sld [smem:[#allocation2 + $0x8]]  ;;  %s1441_s12 = sld [smem:[#allocation2 + $0x43]]  ;;  %v1499_v25 = vadd.s32 128, %v1473_v17  ;;  %v2636_v39 = vand.u32 63, %v1473_v17  ;;  %vm432_vm1 = vcmp.lt.s32.totalorder %v1473_v17, 1  ;;  %vm451_vm4 = vcmp.lt.s32.totalorder %v1473_v17, 127 }
  0x26   :  { %55 = vrot.lane.b32.xlu0 %v1401_v2, %s2572_s4  ;;  %79 = vrot.lane.b32.xlu1 %v1403_v3, %s2572_s4  ;;  %s1443_s13 = sld [smem:[#allocation2 + $0xc]]  ;;  %s1445_s14 = sld [smem:[#allocation2 + $0x1]] }
  0x27   :  { %s1447_s15 = sld [smem:[#allocation2 + $0x5]]  ;;  %s1449_s16 = sld [smem:[#allocation2 + $0x9]]  ;;  %vm1772_vm2 = vcmp.ge.s32.totalorder %v2636_v39, 1 }
  0x28   :  { %2650 = sst [smem:[#allocation12_spill]] %s1429_s6  ;;  %s1451_s17 = sld [smem:[#allocation2 + $0xd]]  ;;  %v2633_v19 = vstv %s1429_s6 }
  0x29   :  { %2651 = sst [smem:[#allocation13_spill]] %s1433_s8  ;;  %s1453_s18 = sld [smem:[#allocation2 + $0x3]]  ;;  %v157_v18 = vstv %s1431_s7  ;;  %v200_v21 = vstv %s1433_s8 }
  0x2a   :  { %2652 = sst [smem:[#allocation14_spill]] %s1435_s9  ;;  %s1455_s19 = sld [smem:[#allocation2 + $0x7]]  ;;  %v197_v20 = vstv %s1435_s9  ;;  %v2632_v23 = vstv %s1437_s10 }
  0x2b   :  { %2653 = sst [smem:[#allocation15_spill]] %s1437_s10  ;;  %s1457_s20 = sld [smem:[#allocation2 + $0xf]]  ;;  %v237_v22 = vstv %s1439_s11  ;;  %v280_v26 = vstv %s1441_s12 }
  0x2c   :  { %2654 = sst [smem:[#allocation16_spill]] %s1441_s12  ;;  %s1459_s21 = sld [smem:[#allocation2 + $0x2]]  ;;  %v277_v24 = vstv %s1443_s13  ;;  %v164_v27 = vstv %s1445_s14 }
  0x2d   :  { %2655 = sst [smem:[#allocation17_spill]] %s1443_s13  ;;  %s1461_s22 = sld [smem:[#allocation2 + $0x6]]  ;;  %v204_v28 = vstv %s1447_s15  ;;  %v244_v29 = vstv %s1449_s16 }
  0x2e   :  { %2656 = sst [smem:[#allocation18_spill]] %s1447_s15  ;;  %s1463_s23 = sld [smem:[#allocation2 + $0xa]]  ;;  %v284_v30 = vstv %s1451_s17 }
  0x2f   :  { %2657 = sst [smem:[#allocation19_spill]] %s1453_s18  ;;  %s1465_s24 = sld [smem:[#allocation2 + $0xe]] }
  0x30   :  { %2658 = sst [smem:[#allocation20_spill]] %s1455_s19  ;;  %s1467_s25 = sld [smem:[#allocation2 + $0x11]] }
  0x31   :  { %2659 = sst [smem:[#allocation21_spill]] %s1457_s20  ;;  %s1477_s30 = sld [smem:[#allocation2 + $0x15]] }
  0x32   :  { %s1469_s26 = sld [smem:[#allocation2 + $0x21]]  ;;  %s1479_s3 = sld [smem:[#allocation2 + $0x25]] }
  0x33   :  { %s1471_s27 = sld [smem:[#allocation2 + $0x19]]  ;;  %s1485_s0 = sld [smem:[#allocation2 + $0x2d]] }
  0x34   :  { %s1475_s28 = sld [smem:[#allocation2 + $0x29]]  ;;  %s1491_s29 = sld [smem:[#allocation2 + $0x13]] }
  0x35   :  { %s1493_s4 = sld [smem:[#allocation2 + $0x2b]]  ;;  %s1501_s2 = sld [smem:[#allocation2 + $0x17]] }
  0x36   :  { %s1503_s9 = sld [smem:[#allocation2 + $0x1d]]  ;;  %s1509_s8 = sld [smem:[#allocation2 + $0x31]] }
  0x37   :  { %2661 = sst [smem:[#allocation23_spill]] %s1477_s30  ;;  %s1517_s13 = sld [smem:[#allocation2 + $0x39]] }
  0x38   :  { %s1511_s10 = sld [smem:[#allocation2 + $0x1b]]  ;;  %s1519_s6 = sld [smem:[#allocation2 + $0x35]]  ;;  %v481_v37 = vstv %s1469_s26  ;;  %v571_v44 = vstv %s1479_s3 }
  0x39   :  { %2660 = sst [smem:[#allocation22_spill]] %s1471_s27  ;;  %s1525_s12 = sld [smem:[#allocation2 + $0x33]]  ;;  %v1546_v47 = vmul.f32 %v481_v37, %v1401_v2  ;;  %v1549_v48 = vmul.f32 %v481_v37, %v1393_v0  ;;  %v751_v50 = vstv %s1485_s0  ;;  %v1568_v55 = vmul.f32 %v571_v44, %v1393_v0 }
  0x3a   :  { %2662 = sst [smem:[#allocation24_spill]] %s1491_s29  ;;  %s1527_s15 = sld [smem:[#allocation2 + $0x20]]  ;;  %v661_v41 = vstv %s1475_s28  ;;  %v1571_v56 = vmul.f32 %v571_v44, %v1401_v2  ;;  %v1588_v62 = vmul.f32 %v751_v50, %v1393_v0  ;;  %v1633_v37 = vmul.f32 %v751_v50, %v1401_v2 }
  0x3b   :  { %2663 = sst [smem:[#allocation25_spill]] %s1493_s4  ;;  %s1533_s18 = sld [smem:[#allocation2 + $0x37]]  ;;  %v1558_v51 = vmul.f32 %v661_v41, %v1393_v0  ;;  %v2616_v54 = vstv %s1493_s4 }
  0x3c   :  { %2664 = sst [smem:[#allocation26_spill]] %s1501_s2  ;;  %s1535_s20 = sld [smem:[#allocation2 + $0x24]]  ;;  %2678 = vst [vmem:[#allocation40_spill] sm:$0xff] %v1633_v37 }
  0x3d   :  { %2665 = sst [smem:[#allocation27_spill]] %s1503_s9  ;;  %s1541_s26 = sld [smem:[#allocation2 + $0x10]] }
  0x3e   :  { %2666 = sst [smem:[#allocation28_spill]] %s1511_s10  ;;  %s1553_s28 = sld [smem:[#allocation2 + $0x3d]] }
  0x3f   :  { %2667 = sst [smem:[#allocation29_spill]] %s1517_s13  ;;  %s1543_s19 = sld [smem:[#allocation2 + $0x28]] }
  0x40   :  { %2668 = sst [smem:[#allocation30_spill]] %s1519_s6  ;;  %s1555_s27 = sld [smem:[#allocation2 + $0x14]] }
  0x41   :  { %2669 = sst [smem:[#allocation31_spill]] %s1525_s12  ;;  %s1577_s0 = sld [smem:[#allocation2 + $0x22]] }
  0x42   :  { %2670 = sst [smem:[#allocation32_spill]] %s1533_s18  ;;  %s1563_s3 = sld [smem:[#allocation2 + $0x3b]] }
  0x43   :  { %2671 = sst [smem:[#allocation33_spill]] %s1541_s26  ;;  %s1590_s29 = sld [smem:[#allocation2 + $0x12]] }
  0x44   :  { %s1600_s2 = sld [smem:[#allocation2 + $0x16]]  ;;  %s1602_s30 = sld [smem:[#allocation2 + $0x2c]] }
  0x45   :  { %43 = vadd.xlane.f32.xlu0 %v42_v4  ;;  %s1610_s9 = sld [smem:[#allocation2 + $0x1c]]  ;;  %s1612_s4 = sld [smem:[#allocation2 + $0x2a]] }
  0x46   :  { %s1621_s10 = sld [smem:[#allocation2 + $0x30]]  ;;  %s1624_s12 = sld [smem:[#allocation2 + $0x2f]] }
  0x47   :  { %s1638_s18 = sld [smem:[#allocation2 + $0x1f]]  ;;  %s2682_s6 = sld [smem:[#allocation15_spill]] }
  0x48   :  { %s1646_s13 = sld [smem:[#allocation2 + $0x34]]  ;;  %s1659_s26 = sld [smem:[#allocation2 + $0x32]] }
  0x49   :  { %2674 = sst [smem:[#allocation36_spill]] %s1590_s29  ;;  %s2723_s29 = sld [smem:[#allocation20_spill]] }
  0x4a   :  { %2675 = sst [smem:[#allocation37_spill]] %s1600_s2  ;;  %v2625_v63 = vstv %s1602_s30  ;;  %s1792_s2 = sld [smem:[#allocation2 + $0x2e]] }
  0x4b   :  { %v2630_v43 = vstv %s1612_s4  ;;  %s2731_s7 = sld [smem:[#allocation23_spill]]  ;;  %s2741_s11 = sld [smem:[#allocation24_spill]] }
  0x4c   :  { %v1719_v32 = vmul.f32 %v2630_v43, %v1395_v1  ;;  %s2744_s14 = sld [smem:[#allocation29_spill]]  ;;  %s2745_s16 = sld [smem:[#allocation26_spill]] }
  0x4d   :  { %2680 = sst [smem:[#allocation42_spill]] %s1638_s18  ;;  %s2746_s17 = sld [smem:[#allocation27_spill]] }
  0x4e   :  { %s2748_s18 = sld [smem:[#allocation30_spill]] }
  0x94   :  { %v54_v5 = vpop.permute.xlu0 %53  ;;  %v78_v6 = vpop.permute.xlu1 %77 }
  0x95   :  { %v59_v7 = vsel %vm41_vm0, %v54_v5, 0.0  ;;  %v83_v8 = vsel %vm41_vm0, %v78_v6, 0.0  ;;  %v1598_v6 = vmul.f32 %v2616_v54, %v1395_v1 }
  0x96   :  { %60 = vadd.xlane.f32.xlu0 %v59_v7 }
  0x98   :  { %v56_v9 = vpop.permute.xlu0 %55  ;;  %v80_v10 = vpop.permute.xlu1 %79 }
  0x99   :  { %v62_v11 = vsel %vm41_vm0, %v56_v9, 0.0  ;;  %v86_v13 = vsel %vm41_vm0, %v80_v10, 0.0  ;;  %v1607_v9 = vmul.f32 %v661_v41, %v1401_v2  ;;  %v465_v10 = vstv %s1527_s15  ;;  %s1636_s15 = sld [smem:[#allocation2 + $0x1a]] }
  0x9a   :  { %63 = vadd.xlane.f32.xlu1 %v62_v11  ;;  %84 = vadd.xlane.f32.xlu0 %v83_v8  ;;  %v645_v41 = vstv %s1543_s19  ;;  %s1648_s19 = sld [smem:[#allocation2 + $0x38]]  ;;  %v1654_v5 = vmul.f32 %v465_v10, %v1401_v2  ;;  %v507_v11 = vstv %s1577_s0  ;;  %s1692_s0 = sld [smem:[#allocation2 + $0x36]] }
  0x9b   :  { %v1663_v50 = vmul.f32 %v645_v41, %v1393_v0  ;;  %v1690_v52 = vmul.f32 %v507_v11, %v1395_v1  ;;  %v1711_v4 = vmul.f32 %v645_v41, %v1401_v2  ;;  %v1744_v36 = vmul.f32 %v507_v11, %v1403_v3 }
  0x9e   :  { %46 = vadd.xlane.f32.xlu1 %v45_v12  ;;  %87 = vadd.xlane.f32.xlu0 %v86_v13 }
  0x9f   :  { %2679 = sst [smem:[#allocation41_spill]] %s1636_s15  ;;  %s2057_s15 = sld [smem:[#allocation2 + $0xb]] }
  0xa2   :  { %68 = vadd.xlane.f32.xlu0 %v67_v14  ;;  %v555_v14 = vstv %s1535_s20  ;;  %s2681_s20 = sld [smem:[#allocation12_spill]] }
  0xa3   :  { %v1680_v58 = vmul.f32 %v555_v14, %v1401_v2 }
  0xa6   :  { %71 = vadd.xlane.f32.xlu0 %v70_v15 }
  0xaf   :  { %424 = vrot.lane.b32.xlu1 %v1393_v0, %s1348_s1 }
  0xb3   :  { %428 = vrot.lane.b32.xlu1 %v1395_v1, %s1348_s1 }
  0xb7   :  { %430 = vrot.lane.b32.xlu1 %v1403_v3, %s1348_s1 }
  0xbb   :  { %445 = vrot.lane.b32.xlu1 %v1401_v2, %s1349_s5 }
  0xbc   :  { %426 = vrot.lane.b32.xlu0 %v1401_v2, %s1348_s1  ;;  %s1481_s1 = sld [smem:[#allocation2 + $0x23]] }
  0xbf   :  { %449 = vrot.lane.b32.xlu1 %v1403_v3, %s1349_s5 }
  0xc0   :  { %443 = vrot.lane.b32.xlu0 %v1393_v0, %s1349_s5 }
  0xc2   :  { %v525_v45 = vstv %s1481_s1  ;;  %s1565_s1 = sld [smem:[#allocation2 + $0x18]] }
  0xc3   :  { %v1574_v57 = vmul.f32 %v525_v45, %v1395_v1  ;;  %v1616_v12 = vmul.f32 %v525_v45, %v1403_v3 }
  0xc4   :  { %447 = vrot.lane.b32.xlu0 %v1395_v1, %s1349_s5  ;;  %s1483_s5 = sld [smem:[#allocation2 + $0x27]] }
  0xc5   :  { %2676 = vst [vmem:[#allocation38_spill] sm:$0xff] %v1616_v12 }
  0xc8   :  { %2672 = sst [smem:[#allocation34_spill]] %s1565_s1  ;;  %s1708_s1 = sld [smem:[#allocation2 + $0x3c]] }
  0xca   :  { %v615_v49 = vstv %s1483_s5  ;;  %s1579_s5 = sld [smem:[#allocation2 + $0x26]] }
  0xcb   :  { %v1584_v60 = vmul.f32 %v615_v49, %v1395_v1  ;;  %v1619_v13 = vmul.f32 %v615_v49, %v1403_v3  ;;  %v1643_v49 = vmul.f32 %v465_v10, %v1393_v0 }
  0xcd   :  { %2677 = vst [vmem:[#allocation39_spill] sm:$0xff] %v1619_v13 }
  0xd2   :  { %v44_v46 = vpop.xlane.xlu0 %43 }
  0xd3   :  { %v1581_v59 = vmul.f32 0.015625, %v44_v46  ;;  %v1657_v46 = vmul.f32 %v555_v14, %v1393_v0 }
  0xd5   :  { %2673 = vst [vmem:[#allocation35_spill] sm:$0xff] %v1581_v59  ;;  %v158_v15 = vmul.f32 %v157_v18, %v1581_v59  ;;  %v238_v16 = vmul.f32 %v237_v22, %v1581_v59  ;;  %v198_v41 = vmul.f32 %v197_v20, %v1581_v59  ;;  %v278_v14 = vmul.f32 %v277_v24, %v1581_v59 }
  0xd7   :  { %v161_v31 = vadd.f32 %v2633_v19, %v158_v15  ;;  %v241_v8 = vadd.f32 %v2632_v23, %v238_v16 }
 0x123   :  { %v61_v44 = vpop.xlane.xlu0 %60 }
 0x124   :  { %v1650_v54 = vmul.f32 0.015625, %v61_v44  ;;  %v597_v44 = vstv %s1579_s5  ;;  %s2789_s5 = sld [smem:[#allocation42_spill]] }
 0x125   :  { %v1697_v15 = vmul.f32 %v597_v44, %v1395_v1  ;;  %v1782_v19 = vmul.f32 %v597_v44, %v1403_v3  ;;  %v2700_v44 = vstv %s1465_s24 }
 0x126   :  { %v165_v10 = vmul.f32 %v164_v27, %v1650_v54  ;;  %v245_v7 = vmul.f32 %v244_v29, %v1650_v54 }
 0x127   :  { %v64_v45 = vpop.xlane.xlu1 %63  ;;  %v1677_v61 = vpop.xlane.xlu0 %84 }
 0x128   :  { %v1685_v16 = vadd.f32 %v165_v10, %v161_v31  ;;  %v1687_v53 = vadd.f32 %v245_v7, %v241_v8  ;;  %v2631_v7 = vstv %s1624_s12  ;;  %v1701_v8 = vmul.f32 0.015625, %v64_v45 }
 0x129   :  { %v1706_v10 = vmul.f32 %v2625_v63, %v1393_v0  ;;  %v1732_v33 = vmul.f32 %v2631_v7, %v1403_v3  ;;  %v205_v45 = vmul.f32 %v204_v28, %v1650_v54  ;;  %v285_v63 = vmul.f32 %v284_v30, %v1650_v54 }
 0x12a   :  { %v166_v38 = vmul.f32 %v164_v27, %v1701_v8  ;;  %v206_v7 = vmul.f32 %v204_v28, %v1701_v8  ;;  %v246_v35 = vmul.f32 %v244_v29, %v1701_v8 }
 0x12b   :  { %v47_v42 = vpop.xlane.xlu1 %46  ;;  %v88_v31 = vpop.xlane.xlu0 %87 }
 0x12c   :  { %v1740_v43 = vmul.f32 0.015625, %v47_v42  ;;  %v286_v42 = vmul.f32 %v284_v30, %v1701_v8  ;;  %v281_v30 = vadd.f32 %v280_v26, %v278_v14 }
 0x12e   :  { %2688 = vst [vmem:[#allocation43_spill] sm:$0xff] %v1740_v43  ;;  %v159_v11 = vmul.f32 %v157_v18, %v1740_v43  ;;  %v199_v34 = vmul.f32 %v197_v20, %v1740_v43  ;;  %v239_v27 = vmul.f32 %v237_v22, %v1740_v43  ;;  %v279_v28 = vmul.f32 %v277_v24, %v1740_v43 }
 0x12f   :  { %v425_v40 = vpop.permute.xlu1 %424  ;;  %v69_v23 = vpop.xlane.xlu0 %68  ;;  %v201_v18 = vadd.f32 %v200_v21, %v198_v41  ;;  %v2691_v22 = vstv %s2681_s20  ;;  %v2692_v43 = vstv %s2682_s6  ;;  %v287_v14 = vadd.f32 %v285_v63, %v281_v30  ;;  %s2730_s6 = sld [smem:[#allocation22_spill]]  ;;  %s2777_s20 = sld [smem:[#allocation36_spill]] }
 0x130   :  { %v162_v59 = vadd.f32 %v2691_v22, %v159_v11  ;;  %v202_v24 = vadd.f32 %v200_v21, %v199_v34  ;;  %v242_v37 = vadd.f32 %v2692_v43, %v239_v27  ;;  %v282_v39 = vadd.f32 %v280_v26, %v279_v28 }
 0x131   :  { %v207_v41 = vadd.f32 %v205_v45, %v201_v18  ;;  %v1794_v20 = vmul.f32 0.015625, %v69_v23  ;;  %v2694_v11 = vand.u32 63, %v1499_v25  ;;  %v2697_v45 = vstv %s1459_s21 }
 0x132   :  { %v168_v43 = vadd.f32 %v166_v38, %v162_v59  ;;  %v208_v27 = vadd.f32 %v206_v7, %v202_v24  ;;  %v248_v26 = vadd.f32 %v246_v35, %v242_v37  ;;  %v288_v28 = vadd.f32 %v286_v42, %v282_v39 }
 0x133   :  { %2693 = vst [vmem:[#allocation44_spill] sm:$0xff] %v1794_v20  ;;  %vm1799_vm3 = vcmp.ge.s32.totalorder %v2694_v11, 1  ;;  %v429_v34 = vpop.permute.xlu1 %428  ;;  %v72_v22 = vpop.xlane.xlu0 %71  ;;  %v171_v23 = vmul.f32 %v2697_v45, %v1794_v20  ;;  %v2698_v63 = vstv %s1461_s22  ;;  %v2699_v30 = vstv %s1463_s23 }
 0x134   :  { %v211_v18 = vmul.f32 %v2698_v63, %v1794_v20  ;;  %v251_v11 = vmul.f32 %v2699_v30, %v1794_v20  ;;  %v291_v13 = vmul.f32 %v2700_v44, %v1794_v20  ;;  %v1816_v38 = vmul.f32 0.015625, %v1677_v61 }
 0x135   :  { %v1818_v35 = vmul.f32 0.015625, %v72_v22  ;;  %v2703_v39 = vstv %s1602_s30  ;;  %v2704_v37 = vstv %s1612_s4  ;;  %v1832_v42 = vadd.f32 %v171_v23, %v1685_v16  ;;  %s2724_s4 = sld [smem:[#allocation21_spill]]  ;;  %s2768_s30 = sld [smem:[#allocation34_spill]] }
 0x136   :  { %2701 = vst [vmem:[#allocation45_spill] sm:$0xff] %v1816_v38  ;;  %v1824_v59 = vmul.f32 %v2703_v39, %v1401_v2  ;;  %v1829_v7 = vmul.f32 %v2704_v37, %v1403_v3  ;;  %v1834_v24 = vadd.f32 %v211_v18, %v207_v41  ;;  %v1837_v61 = vadd.f32 %v251_v11, %v1687_v53 }
 0x137   :  { %2702 = vst [vmem:[#allocation46_spill] sm:$0xff] %v1818_v35  ;;  %2705 = vst [vmem:[#allocation47_spill] sm:$0xff] %v1832_v42  ;;  %v1839_v44 = vadd.f32 %v291_v13, %v287_v14  ;;  %v2709_v22 = vand.u32 63, %v1473_v17  ;;  %v1847_v63 = vmul.f32 0.015625, %v88_v31  ;;  %v2713_v30 = vstv %s1459_s21  ;;  %v431_v18 = vpop.permute.xlu1 %430  ;;  %v427_v53 = vpop.permute.xlu0 %426  ;;  %s2749_s21 = sld [smem:[#allocation31_spill]] }
 0x138   :  { %2706 = vst [vmem:[#allocation48_spill] sm:$0xff] %v1834_v24  ;;  %2707 = vst [vmem:[#allocation49_spill] sm:$0xff] %v1837_v61  ;;  %v172_v16 = vmul.f32 %v2713_v30, %v1818_v35  ;;  %v2714_v41 = vstv %s1461_s22  ;;  %v2715_v13 = vand.u32 63, %v1499_v25  ;;  %v1863_v11 = vsub.f32 %v1393_v0, %v1650_v54  ;;  %s2751_s22 = sld [smem:[#allocation32_spill]] }
 0x139   :  { %2708 = vst [vmem:[#allocation50_spill] sm:$0xff] %v1839_v44  ;;  %vm1843_vm5 = vcmp.le.s32.totalorder %v2709_v22, 62  ;;  %2712 = vst [vmem:[#allocation51_spill] sm:$0xff] %v1847_v63  ;;  %v212_v23 = vmul.f32 %v2714_v41, %v1818_v35  ;;  %v435_v31 = vsel %vm432_vm1, %v429_v34, %v425_v40  ;;  %v2719_v39 = vstv %s1463_s23  ;;  %s2753_s23 = sld [smem:[#allocation28_spill]] }
 0x13a   :  { %vm1857_vm6 = vcmp.le.s32.totalorder %v2715_v13, 62  ;;  %2718 = vst [vmem:[#allocation52_spill] sm:$0xff] %v1863_v11  ;;  %v252_v37 = vmul.f32 %v2719_v39, %v1818_v35  ;;  %v2720_v22 = vstv %s1465_s24  ;;  %v436_v25 = vsel %vm432_vm1, %v431_v18, %v427_v53  ;;  %s2004_s24 = sld [smem:[#allocation2 + $0x3f]] }
 0x13b   :  { %v292_v30 = vmul.f32 %v2720_v22, %v1818_v35  ;;  %v1875_v41 = vadd.f32 %v172_v16, %v168_v43  ;;  %v1877_v13 = vadd.f32 %v212_v23, %v208_v27  ;;  %v1881_v0 = vsub.f32 %v1401_v2, %v1701_v8  ;;  %v446_v27 = vpop.permute.xlu1 %445 }
 0x13c   :  { %v777_v54 = vstv %s1792_s2  ;;  %v1884_v20 = vadd.f32 %v252_v37, %v248_v26  ;;  %v1890_v22 = vsel %vm1772_vm2, %v436_v25, 0.0  ;;  %v1894_v43 = vsub.f32 %v1395_v1, %v1816_v38  ;;  %v444_v26 = vpop.permute.xlu0 %443  ;;  %s2159_s2 = sld [smem:[#allocation2 + $0x3e]] }
 0x13d   :  { %2721 = vst [vmem:[#allocation53_spill] sm:$0xff] %v1875_v41  ;;  %2722 = vst [vmem:[#allocation54_spill] sm:$0xff] %v1881_v0  ;;  %v1886_v39 = vadd.f32 %v292_v30, %v288_v28  ;;  %v433_v2 = vsel %vm432_vm1, %v425_v40, %v429_v34  ;;  %v1900_v8 = vsel %vm1772_vm2, %v435_v31, 0.0  ;;  %v1904_v28 = vsub.f32 %v1403_v3, %v1847_v63 }
 0x13e   :  { %2725 = vst [vmem:[#allocation55_spill] sm:$0xff] %v1884_v20  ;;  %2727 = vst [vmem:[#allocation57_spill] sm:$0xff] %v1894_v43  ;;  %v2729_v16 = vstv %s1624_s12  ;;  %v434_v37 = vsel %vm432_vm1, %v427_v53, %v431_v18  ;;  %v1915_v40 = vmul.f32 %v1863_v11, %v1863_v11  ;;  %v1918_v29 = vmul.f32 %v777_v54, %v1403_v3  ;;  %s1956_s12 = sld [smem:[#allocation2 + $0x3a]] }
 0x13f   :  { %2726 = vst [vmem:[#allocation56_spill] sm:$0xff] %v1886_v39  ;;  %2728 = vst [vmem:[#allocation58_spill] sm:$0xff] %v1904_v28  ;;  %v1909_v23 = vmul.f32 %v2729_v16, %v1395_v1  ;;  %v1921_v34 = vmul.f32 %v777_v54, %v1395_v1  ;;  %v2734_v31 = vstv %s2723_s29  ;;  %v2736_v25 = vstv %s2724_s4  ;;  %s1119_s29 = sld [smem:[#allocation2 + $0x4b]] }
 0x140   :  { %2732 = vst [vmem:[#allocation59_spill] sm:$0xff] %v1918_v29  ;;  %v1926_v30 = vmul.f32 %v2734_v31, %v1816_v38  ;;  %v1931_v16 = vmul.f32 %v2736_v25, %v1816_v38  ;;  %v2738_v18 = vmov %v2734_v31  ;;  %v2739_v11 = vstv %s1467_s25  ;;  %s2766_s25 = sld [smem:[#allocation33_spill]] }
 0x141   :  { %2733 = vst [vmem:[#allocation60_spill] sm:$0xff] %v1921_v34  ;;  %v1936_v53 = vmul.f32 %v2738_v18, %v1847_v63  ;;  %v479_v35 = vmul.f32 %v2739_v11, %v1890_v22  ;;  %v1943_v1 = vsel %vm1799_vm3, %v433_v2, 0.0  ;;  %v2740_v54 = vmov %v2739_v11  ;;  %v450_v2 = vpop.permute.xlu1 %449  ;;  %v448_v18 = vpop.permute.xlu0 %447 }
 0x142   :  { %2735 = vst [vmem:[#allocation61_spill] sm:$0xff] %v1926_v30  ;;  %2737 = vst [vmem:[#allocation62_spill] sm:$0xff] %v1931_v16  ;;  %v478_v31 = vmul.f32 %v2740_v54, %v1900_v8  ;;  %v1950_v3 = vmul.f32 %v1881_v0, %v1881_v0  ;;  %v1954_v25 = vmul.f32 %v1894_v43, %v1894_v43  ;;  %v1960_v11 = vsel %vm1799_vm3, %v434_v37, 0.0 }
 0x143   :  { %v2742_v54 = vstv %s2730_s6  ;;  %v2743_v0 = vstv %s2731_s7  ;;  %v1970_v43 = vmul.f32 %v1904_v28, %v1904_v28  ;;  %v453_v21 = vsel %vm451_vm4, %v446_v27, %v450_v2  ;;  %s2467_s7 = sld [smem:[#allocation2 + $0x48]] }
 0x144   :  { %v658_v20 = vmul.f32 %v2742_v54, %v1900_v8  ;;  %v568_v34 = vmul.f32 %v2743_v0, %v1900_v8  ;;  %v452_v37 = vsel %vm451_vm4, %v444_v26, %v448_v18  ;;  %v454_v61 = vsel %vm451_vm4, %v448_v18, %v444_v26 }
 0x145   :  { %v2747_v54 = vmov %v2743_v0  ;;  %v1983_v0 = vsel %vm1843_vm5, %v453_v21, 0.0  ;;  %v1987_v28 = vsel %vm1843_vm5, %v452_v37, 0.0  ;;  %v485_v41 = vadd.f32 %v1546_v47, %v479_v35 }
 0x146   :  { %v569_v42 = vmul.f32 %v2747_v54, %v1890_v22  ;;  %v2750_v39 = vstv %s2741_s11  ;;  %v1995_v18 = vsel %vm1857_vm6, %v454_v61, 0.0  ;;  %v2752_v21 = vstv %s1509_s8  ;;  %s2764_s8 = smov 64  }
 0x147   :  { %v522_v26 = vmul.f32 %v2750_v39, %v1943_v1  ;;  %v489_v54 = vmul.f32 %v2752_v21, %v1983_v0  ;;  %v484_v45 = vadd.f32 %v1549_v48, %v478_v31  ;;  %v2754_v37 = vmov %v2752_v21 }
 0x148   :  { %v488_v16 = vmul.f32 %v2754_v37, %v1987_v28  ;;  %v664_v47 = vadd.f32 %v1558_v51, %v658_v20  ;;  %v2755_v35 = vstv %s2744_s14  ;;  %v2756_v61 = vstv %s2745_s16 }
 0x149   :  { %v668_v39 = vmul.f32 %v2755_v35, %v1987_v28  ;;  %v612_v44 = vmul.f32 %v2756_v61, %v1943_v1  ;;  %v2757_v38 = vstv %s2746_s17  ;;  %v491_v30 = vadd.f32 %v489_v54, %v485_v41 }
 0x14a   :  { %v748_v21 = vmul.f32 %v2757_v38, %v1900_v8  ;;  %v490_v48 = vadd.f32 %v488_v16, %v484_v45  ;;  %v2758_v31 = vstv %s2748_s18  ;;  %v2760_v20 = vstv %s2749_s21 }
 0x14b   :  { %v578_v37 = vmul.f32 %v2758_v31, %v1987_v28  ;;  %v2759_v24 = vmov %v2758_v31  ;;  %v532_v29 = vmul.f32 %v2760_v20, %v1995_v18  ;;  %v2761_v35 = vstv %s2751_s22  ;;  %496 = vrot.lane.b32.xlu0 %v491_v30, %s2764_s8 }
 0x14c   :  { %v579_v51 = vmul.f32 %v2759_v24, %v1983_v0  ;;  %v622_v12 = vmul.f32 %v2761_v35, %v1995_v18  ;;  %v2762_v61 = vstv %s1553_s28  ;;  %v2763_v38 = vstv %s2753_s23  ;;  %494 = vrot.lane.b32.xlu1 %v490_v48, %s2764_s8 }
 0x14d   :  { %v758_v63 = vmul.f32 %v2762_v61, %v1987_v28  ;;  %v702_v41 = vmul.f32 %v2763_v38, %v1943_v1  ;;  %v574_v16 = vadd.f32 %v1568_v55, %v568_v34  ;;  %v575_v24 = vadd.f32 %v1571_v56, %v569_v42 }
 0x14e   :  { %v2765_v54 = vstv %s2730_s6  ;;  %v693_v31 = vstv %s1956_s12  ;;  %v528_v20 = vadd.f32 %v1574_v57, %v522_v26  ;;  %v618_v35 = vadd.f32 %v1584_v60, %v612_v44  ;;  %s1172_s6 = sld [smem:[#allocation2 + $0x47]]  ;;  %s1117_s12 = sld [smem:[#allocation2 + $0x4a]] }
 0x14f   :  { %v659_v45 = vmul.f32 %v2765_v54, %v1890_v22  ;;  %v754_v61 = vadd.f32 %v1588_v62, %v748_v21  ;;  %v2767_v30 = vstv %s2741_s11  ;;  %v455_v55 = vsel %vm451_vm4, %v450_v2, %v446_v27  ;;  %s2475_s11 = sld [smem:[#allocation2 + $0x4c]] }
 0x150   :  { %v2048_v48 = vmul.f32 %v2767_v30, %v1960_v11  ;;  %v670_v56 = vadd.f32 %v668_v39, %v664_v47  ;;  %v580_v42 = vadd.f32 %v578_v37, %v574_v16  ;;  %v581_v57 = vadd.f32 %v579_v51, %v575_v24 }
 0x151   :  { %v534_v34 = vadd.f32 %v532_v29, %v528_v20  ;;  %v624_v60 = vadd.f32 %v622_v12, %v618_v35  ;;  %v2052_v62 = vadd.f32 %v758_v63, %v754_v61  ;;  %v2055_v44 = vadd.f32 %v1598_v6, %v702_v41 }
 0x152   :  { %674 = vrot.lane.b32.xlu0 %v670_v56, %s2764_s8  ;;  %584 = vrot.lane.b32.xlu1 %v580_v42, %s2764_s8  ;;  %v2769_v17 = vstv %s1563_s3  ;;  %v2067_v12 = vadd.f32 %v1607_v9, %v659_v45  ;;  %v2770_v63 = vstv %s2766_s25 }
 0x153   :  { %v2064_v27 = vmul.f32 %v2769_v17, %v1995_v18  ;;  %v462_v6 = vmul.f32 %v2770_v63, %v1900_v8  ;;  %v801_v29 = vstv %s2004_s24  ;;  %v2771_v2 = vstv %s2744_s14  ;;  %s1118_s14 = sld [smem:[#allocation2 + $0x4e]] }
 0x154   :  { %v2076_v26 = vmul.f32 %v2771_v2, %v1983_v0  ;;  %v2772_v47 = vstv %s1621_s10  ;;  %v2773_v21 = vmov %v2770_v63  ;;  %v2775_v41 = vstv %s1555_s27  ;;  %s2781_s10 = sld [smem:[#allocation37_spill]]  ;;  %s2786_s27 = sld [smem:[#allocation41_spill]] }
 0x155   :  { %v472_v39 = vmul.f32 %v2772_v47, %v1987_v28  ;;  %v463_v37 = vmul.f32 %v2773_v21, %v1890_v22  ;;  %v2774_v51 = vmov %v2772_v47  ;;  %v468_v9 = vadd.f32 %v1643_v49, %v462_v6 }
 0x156   :  { %v473_v38 = vmul.f32 %v2774_v51, %v1983_v0  ;;  %v552_v16 = vmul.f32 %v2775_v41, %v1900_v8  ;;  %v2776_v24 = vstv %s1646_s13  ;;  %v2778_v45 = vstv %s2768_s30  ;;  %111 = vrot.lane.b32.xlu0 %v1950_v3, %s2764_s8  ;;  %586 = vrot.lane.b32.xlu1 %v581_v57, %s2764_s8  ;;  %s2118_s13 = sld [smem:[#allocation2 + $0x1e]] }
 0x157   :  { %v562_v54 = vmul.f32 %v2776_v24, %v1987_v28  ;;  %v642_v20 = vmul.f32 %v2778_v45, %v1900_v8  ;;  %v469_v35 = vadd.f32 %v1654_v5, %v463_v37  ;;  %v2779_v61 = vstv %s1648_s19  ;;  %s1115_s19 = sld [smem:[#allocation2 + $0x49]] }
 0x158   :  { %v652_v30 = vmul.f32 %v2779_v61, %v1987_v28  ;;  %v2780_v56 = vmov %v2775_v41  ;;  %v2782_v42 = vmov %v2776_v24  ;;  %v2109_v63 = vsel %vm1857_vm6, %v455_v55, 0.0 }
 0x159   :  { %v553_v49 = vmul.f32 %v2780_v56, %v1890_v22  ;;  %v563_v17 = vmul.f32 %v2782_v42, %v1983_v0  ;;  %v2114_v5 = vadd.f32 %v472_v39, %v468_v9  ;;  %v558_v6 = vadd.f32 %v1657_v46, %v552_v16 }
 0x15a   :  { %v648_v2 = vadd.f32 %v1663_v50, %v642_v20  ;;  %v2120_v47 = vadd.f32 %v473_v38, %v469_v35  ;;  %v2783_v3 = vstv %s2777_s20  ;;  %v2784_v57 = vstv %s1659_s26  ;;  %538 = vrot.lane.b32.xlu0 %v534_v34, %s2764_s8  ;;  %109 = vrot.lane.b32.xlu1 %v1915_v40, %s2764_s8  ;;  %s2818_s26 = sld [smem:[#allocation25_spill]] }
 0x15b   :  { %v559_v14 = vadd.f32 %v1680_v58, %v553_v49  ;;  %v504_v55 = vmul.f32 %v2783_v3, %v1943_v1  ;;  %v514_v39 = vmul.f32 %v2784_v57, %v1995_v18  ;;  %v2129_v21 = vadd.f32 %v562_v54, %v558_v6 }
 0x15c   :  { %v2131_v37 = vadd.f32 %v652_v30, %v648_v2  ;;  %v2785_v46 = vstv %s2781_s10  ;;  %v2787_v51 = vstv %s1692_s0  ;;  %v2788_v41 = vstv %s1610_s9  ;;  %s2802_s9 = sld [smem:[#allocation19_spill]] }
 0x15d   :  { %v594_v50 = vmul.f32 %v2785_v46, %v1943_v1  ;;  %v604_v38 = vmul.f32 %v2787_v51, %v1995_v18  ;;  %v2139_v58 = vadd.f32 %v563_v17, %v559_v14  ;;  %v510_v9 = vadd.f32 %v1690_v52, %v504_v55 }
 0x15e   :  { %v732_v16 = vmul.f32 %v2788_v41, %v1900_v8  ;;  %v2790_v24 = vstv %s1708_s1  ;;  %v256_v45 = vstv %s2057_s15  ;;  %v2791_v52 = vstv %s2768_s30  ;;  %628 = vrot.lane.b32.xlu0 %v624_v60, %s2764_s8  ;;  %s2375_s1 = sld [smem:[#allocation2 + $0x46]] }
 0x15f   :  { %v742_v54 = vmul.f32 %v2790_v24, %v1987_v28  ;;  %v600_v20 = vadd.f32 %v1697_v15, %v594_v50  ;;  %v643_v35 = vmul.f32 %v2791_v52, %v1890_v22  ;;  %v653_v8 = vmul.f32 %v2779_v61, %v1983_v0  ;;  %141 = vrot.lane.b32.xlu1 %v1954_v25, %s2764_s8 }
 0x160   :  { %v2161_v30 = vadd.f32 %v514_v39, %v510_v9  ;;  %v738_v28 = vadd.f32 %v1706_v10, %v732_v16  ;;  %v2792_v34 = vstv %s2786_s27  ;;  %v694_v15 = vmul.f32 %v693_v31, %v1995_v18 }
 0x161   :  { %v684_v40 = vmul.f32 %v2792_v34, %v1943_v1  ;;  %v2170_v56 = vadd.f32 %v604_v38, %v600_v20  ;;  %v649_v49 = vadd.f32 %v1711_v4, %v643_v35  ;;  %v2793_v42 = vstv %s2789_s5 }
 0x162   :  { %v793_v17 = vmul.f32 %v2793_v42, %v1960_v11  ;;  %v803_v6 = vmul.f32 %v801_v29, %v2109_v63  ;;  %v2179_v10 = vadd.f32 %v742_v54, %v738_v28  ;;  %v2794_v14 = vmov %v2783_v3  ;;  %764 = vrot.lane.b32.xlu0 %v2052_v62, %s2764_s8 }
 0x163   :  { %v690_v2 = vadd.f32 %v1719_v32, %v684_v40  ;;  %v505_v3 = vmul.f32 %v2794_v14, %v1960_v11  ;;  %v2795_v55 = vmov %v2784_v57  ;;  %v2191_v4 = vadd.f32 %v653_v8, %v649_v49  ;;  %143 = vrot.lane.b32.xlu1 %v1970_v43, %s2764_s8 }
 0x164   :  { %v515_v57 = vmul.f32 %v2795_v55, %v2109_v63  ;;  %v799_v39 = vadd.f32 %v1732_v33, %v793_v17  ;;  %v2796_v32 = vmov %v2785_v46  ;;  %v773_v50 = vstv %s2118_s13  ;;  %v2808_v55 = vld [vmem:[#allocation48_spill] sm:$0xff] }
 0x165   :  { %v595_v46 = vmul.f32 %v2796_v32, %v1960_v11  ;;  %v2198_v51 = vadd.f32 %v694_v15, %v690_v2  ;;  %v511_v38 = vadd.f32 %v1744_v36, %v505_v3  ;;  %v2797_v60 = vstv %s1692_s0  ;;  %v2810_v32 = vld [vmem:[#allocation45_spill] sm:$0xff]  ;;  %s1116_s0 = sld [smem:[#allocation2 + $0x4d]] }
 0x166   :  { %v605_v9 = vmul.f32 %v2797_v60, %v2109_v63  ;;  %v2798_v25 = vmov %v2788_v41  ;;  %v2207_v16 = vadd.f32 %v803_v6, %v799_v39  ;;  %v743_v54 = vmul.f32 %v2790_v24, %v1983_v0 }
 0x167   :  { %v733_v41 = vmul.f32 %v2798_v25, %v1890_v22  ;;  %v601_v33 = vadd.f32 %v1782_v19, %v595_v46  ;;  %v2799_v20 = vmov %v2792_v34  ;;  %v2216_v35 = vadd.f32 %v515_v57, %v511_v38  ;;  %v2809_v57 = vld [vmem:[#allocation61_spill] sm:$0xff]  ;;  %v2813_v25 = vld [vmem:[#allocation62_spill] sm:$0xff] }
 0x168   :  { %v685_v52 = vmul.f32 %v2799_v20, %v1960_v11  ;;  %v695_v61 = vmul.f32 %v693_v31, %v2109_v63  ;;  %v2800_v8 = vmov %v2793_v42  ;;  %v783_v40 = vstv %s2159_s2 }
 0x169   :  { %v739_v36 = vadd.f32 %v1824_v59, %v733_v41  ;;  %v792_v28 = vmul.f32 %v2800_v8, %v1943_v1  ;;  %v2229_v19 = vadd.f32 %v605_v9, %v601_v33  ;;  %v802_v59 = vmul.f32 %v801_v29, %v1995_v18  ;;  %v2812_v9 = vld [vmem:[#allocation50_spill] sm:$0xff]  ;;  %v2814_v33 = vld [vmem:[#allocation56_spill] sm:$0xff] }
 0x16a   :  { %v691_v34 = vadd.f32 %v1829_v7, %v685_v52  ;;  %v714_v31 = vadd.f32 %v2064_v27, %v2055_v44  ;;  %v2801_v15 = vstv %s2749_s21  ;;  %v671_v62 = vadd.f32 %v2076_v26, %v2067_v12  ;;  %v2803_v27 = vld [vmem:[#allocation51_spill] sm:$0xff] }
 0x16b   :  { %v533_v49 = vmul.f32 %v2801_v15, %v2109_v63  ;;  %v2241_v42 = vadd.f32 %v743_v54, %v739_v36  ;;  %v798_v43 = vadd.f32 %v1909_v23, %v792_v28  ;;  %v2250_v29 = vadd.f32 %v1936_v53, %v1877_v13  ;;  %v2806_v13 = vld [vmem:[#allocation38_spill] sm:$0xff]  ;;  %v2807_v26 = vld [vmem:[#allocation59_spill] sm:$0xff]  ;;  %v2819_v15 = vld [vmem:[#allocation39_spill] sm:$0xff] }
 0x16c   :  { %v2246_v7 = vadd.f32 %v695_v61, %v691_v34  ;;  %v775_v44 = vmul.f32 %v773_v50, %v1960_v11  ;;  %v2804_v17 = vstv %s2724_s4  ;;  %v2805_v2 = vstv %s2745_s16  ;;  %718 = vrot.lane.b32.xlu0 %v714_v31, %s2764_s8  ;;  %676 = vrot.lane.b32.xlu1 %v671_v62, %s2764_s8  ;;  %s1120_s4 = sld [smem:[#allocation2 + $0x4f]]  ;;  %s1350_s16 = smov [#allocation7]  }
 0x16d   :  { %v298_v6 = vmul.f32 %v2804_v17, %v2803_v27  ;;  %v613_v14 = vmul.f32 %v2805_v2, %v1960_v11  ;;  %v2259_v23 = vadd.f32 %v802_v59, %v798_v43  ;;  %v785_v12 = vmul.f32 %v783_v40, %v2109_v63  ;;  %v2820_v43 = vld [vmem:[#allocation53_spill] sm:$0xff]  ;;  %v2824_v2 = vld [vmem:[#allocation55_spill] sm:$0xff] }
 0x16e   :  { %v529_v53 = vadd.f32 %v2806_v13, %v2048_v48  ;;  %v781_v3 = vadd.f32 %v2807_v26, %v775_v44  ;;  %v2269_v39 = vadd.f32 %v2809_v57, %v2808_v55  ;;  %v2811_v46 = vstv %s2802_s9  ;;  %v2821_v44 = vld [vmem:[#allocation47_spill] sm:$0xff] }
 0x16f   :  { %v177_v38 = vmul.f32 %v2811_v46, %v2810_v32  ;;  %v257_v60 = vmul.f32 %v256_v45, %v2810_v32  ;;  %v2279_v41 = vadd.f32 %v2813_v25, %v2812_v9  ;;  %v2282_v24 = vadd.f32 %v298_v6, %v2814_v33 }
 0x170   :  { %v2815_v48 = vmov %v2811_v46  ;;  %v535_v20 = vadd.f32 %v533_v49, %v529_v53  ;;  %v2816_v52 = vstv %s2751_s22  ;;  %v2290_v61 = vadd.f32 %v785_v12, %v781_v3  ;;  %v2828_v3 = vld [vmem:[#allocation11_spill] sm:$0xff] }
 0x171   :  { %v178_v54 = vmul.f32 %v2815_v48, %v2803_v27  ;;  %v623_v36 = vmul.f32 %v2816_v52, %v2109_v63  ;;  %v258_v8 = vmul.f32 %v256_v45, %v2803_v27  ;;  %v2817_v28 = vstv %s2746_s17  ;;  %v2822_v45 = vld [vmem:[#allocation49_spill] sm:$0xff]  ;;  %s1073_s17 = sshll.u32 %s1350_s16, 4  ;;  %s1074_s17 = int_to_ptr.vmem [resolvable:$true] %s1073_s17 }
 0x172   :  { %v749_v34 = vmul.f32 %v2817_v28, %v1890_v22  ;;  %v774_v59 = vmul.f32 %v773_v50, %v1943_v1  ;;  %v784_v31 = vmul.f32 %v783_v40, %v1995_v18  ;;  %540 = vrot.lane.b32.xlu1 %v535_v20, %s2764_s8  ;;  %v619_v49 = vadd.f32 %v2819_v15, %v613_v14  ;;  %v2823_v22 = vld [vmem:[#allocation60_spill] sm:$0xff]  ;;  %v2826_v14 = vld [vmem:[#allocation40_spill] sm:$0xff]  ;;  %s1315_s18 = scalar_lea.vmem %s1074_s17, 512  ;;  %p1320_p12 = scmp.lt.s32.totalorder %s1074_s17, %s1074_s17 }
 0x173   :  { %v2303_v62 = vadd.f32 %v178_v54, %v2820_v43  ;;  %v2306_v17 = vadd.f32 %v177_v38, %v2821_v44  ;;  %v2309_v27 = vadd.f32 %v257_v60, %v2822_v45  ;;  %v2313_v1 = vadd.f32 %v258_v8, %v2824_v2  ;;  %p1316_p11 = scmp.ne.s32.totalorder %s1074_s17, %s1315_s18  ;;  %p1321_p13 = scmp.lt.s32.totalorder %s1315_s18, %s1315_s18 }
 0x174   :  { %v780_v6 = vadd.f32 %v2823_v22, %v774_v59  ;;  %v625_v18 = vadd.f32 %v623_v36, %v619_v49  ;;  %v2825_v50 = vstv %s1553_s28  ;;  %v755_v13 = vadd.f32 %v2826_v14, %v749_v34  ;;  %s2362_s28 = sld [smem:[#allocation2 + $0x44]] }
 0x175   :  { %v759_v40 = vmul.f32 %v2825_v50, %v1983_v0  ;;  %v2827_v53 = vstv %s2753_s23  ;;  %v2829_v55 = vstv %s2818_s26  ;;  %v2830_v46 = vstv %s1563_s3  ;;  %s2370_s3 = sld [smem:[#allocation2 + $0x45]]  ;;  %p1322_p0 = por %p1321_p13, %p1320_p12 }
 0x176   :  { %v786_v12 = vadd.f32 %v784_v31, %v780_v6  ;;  %630 = vrot.lane.b32.xlu1 %v625_v18, %s2764_s8  ;;  %v703_v26 = vmul.f32 %v2827_v53, %v1960_v11  ;;  %v707_v57 = vmul.f32 %v2829_v55, %v2828_v3  ;;  %v713_v38 = vmul.f32 %v2830_v46, %v2109_v63 }
 0x177   :  { %v761_v32 = vadd.f32 %v759_v40, %v755_v13  ;;  %v2831_v40 = vld [vmem:[#allocation43_spill] sm:$0xff]  ;;  %p1323_p1 = pnand %p1322_p0, %p1316_p11 }
 0x178   :  { %v709_v60 = vadd.f32 %v707_v57, %v703_v26  ;;  %v2385_v57 = vld [vmem:[#allocation6] sm:$0xff] }
 0x17a   :  { %766 = vrot.lane.b32.xlu1 %v761_v32, %s2764_s8  ;;  %v715_v9 = vadd.f32 %v713_v38, %v709_v60  ;;  %v2832_v32 = vld [vmem:[#allocation35_spill] sm:$0xff]  ;;  %v727_v38 = vstv %s2375_s1 }
 0x17b   :  { %v637_v53 = vstv %s2370_s3  ;;  %v2389_v46 = vsub.f32 %v2385_v57, %v2832_v32 }
 0x17e   :  { %720 = vrot.lane.b32.xlu1 %v715_v9, %s2764_s8  ;;  %v93_v9 = vmul.f32 %v2389_v46, %v2389_v46 }
 0x1bd   :  { %v497_v25 = vpop.permute.xlu0 %496 }
 0x1be   :  { %v495_v0 = vpop.permute.xlu1 %494  ;;  %v501_v48 = vadd.f32 %v497_v25, %v2120_v47  ;;  %v2398_v25 = vld [vmem:[#allocation6 + $0x8] sm:$0xff] }
 0x1bf   :  { %v500_v33 = vadd.f32 %v495_v0, %v2114_v5 }
 0x1c0   :  { %v2335_v54 = vadd.f32 %v2216_v35, %v501_v48 }
 0x1c1   :  { %v518_v11 = vadd.f32 %v2161_v30, %v500_v33  ;;  %v2833_v33 = vld [vmem:[#allocation44_spill] sm:$0xff] }
 0x1c2   :  { %v2402_v48 = vsub.f32 %v2398_v25, %v2833_v33 }
 0x1c4   :  { %v585_v20 = vpop.permute.xlu1 %584  ;;  %v675_v52 = vpop.permute.xlu0 %674 }
 0x1c5   :  { %v590_v63 = vadd.f32 %v585_v20, %v2129_v21  ;;  %v680_v36 = vadd.f32 %v675_v52, %v2131_v37  ;;  %v125_v52 = vmul.f32 %v2402_v48, %v2402_v48 }
 0x1c7   :  { %v608_v8 = vadd.f32 %v2170_v56, %v590_v63  ;;  %v698_v28 = vadd.f32 %v2198_v51, %v680_v36  ;;  %v2409_v63 = vld [vmem:[#allocation6 + $0x18] sm:$0xff]  ;;  %v2834_v36 = vld [vmem:[#allocation46_spill] sm:$0xff] }
 0x1c8   :  { %v587_v34 = vpop.permute.xlu1 %586  ;;  %v112_v59 = vpop.permute.xlu0 %111 }
 0x1c9   :  { %v591_v5 = vadd.f32 %v587_v34, %v2139_v58  ;;  %v118_v47 = vsel %vm41_vm0, %v112_v59, 0.0  ;;  %v127_v34 = vsel %vm41_vm0, %v125_v52, 0.0 }
 0x1ca   :  { %119 = vadd.xlane.f32.xlu1 %v118_v47 }
 0x1cb   :  { %v2344_v30 = vadd.f32 %v2229_v19, %v591_v5 }
 0x1cc   :  { %v110_v35 = vpop.permute.xlu1 %109  ;;  %v539_v31 = vpop.permute.xlu0 %538 }
 0x1cd   :  { %v115_v21 = vsel %vm41_vm0, %v110_v35, 0.0 }
 0x1ce   :  { %116 = vadd.xlane.f32.xlu0 %v115_v21 }
 0x1d0   :  { %v629_v15 = vpop.permute.xlu0 %628 }
 0x1d1   :  { %v142_v37 = vpop.permute.xlu1 %141 }
 0x1d2   :  { %v147_v56 = vsel %vm41_vm0, %v142_v37, 0.0 }
 0x1d3   :  { %148 = vadd.xlane.f32.xlu0 %v147_v56 }
 0x1d4   :  { %v765_v49 = vpop.permute.xlu0 %764 }
 0x1d5   :  { %v144_v51 = vpop.permute.xlu1 %143  ;;  %v770_v58 = vadd.f32 %v765_v49, %v2179_v10  ;;  %v1097_v49 = vmul.f32 -1.442695, %v2269_v39 }
 0x1d6   :  { %v150_v43 = vsel %vm41_vm0, %v144_v51, 0.0  ;;  %v1098_v51 = vmul.f32 -1.442695, %v2250_v29 }
 0x1d7   :  { %151 = vadd.xlane.f32.xlu0 %v150_v43  ;;  %v2350_v44 = vadd.f32 %v786_v12, %v770_v58  ;;  %v1111_v58 = vmul.f32 -1.442695, %v2279_v41  ;;  %v1112_v43 = vmul.f32 -1.442695, %v2282_v24 }
 0x1d8   :  { %1183 = vpow2.f32 %v1098_v51 }
 0x1d9   :  { %1185 = vpow2.f32 %v1097_v49 }
 0x1da   :  { %1187 = vpow2.f32 %v1111_v58  ;;  %v352_v58 = vstv %s1116_s0 }
 0x1db   :  { %810 = vrot.lane.b32.xlu1 %v2207_v16, %s2764_s8  ;;  %1189 = vpow2.f32 %v1112_v43 }
 0x1de   :  { %v677_v19 = vpop.permute.xlu1 %676  ;;  %v719_v13 = vpop.permute.xlu0 %718 }
 0x1df   :  { %v681_v45 = vadd.f32 %v677_v19, %v2191_v4  ;;  %v2364_v4 = vld [vmem:[#allocation6 + $0x10] sm:$0xff]  ;;  %v724_v26 = vadd.f32 %v719_v13, %v698_v28 }
 0x1e0   :  { %v2368_v16 = vsub.f32 %v2364_v4, %v2831_v40 }
 0x1e1   :  { %v699_v22 = vadd.f32 %v2246_v7, %v681_v45  ;;  %v544_v7 = vadd.f32 %v539_v31, %v518_v11  ;;  %v2396_v0 = vadd.f32 %v727_v38, %v724_v26  ;;  %v95_v11 = vsel %vm41_vm0, %v93_v9, 0.0 }
 0x1e2   :  { %v1184_v19 = vpop.eup %1183 }
 0x1e3   :  { %v884_v20 = vsel %vm41_vm0, %v2396_v0, 0.0  ;;  %v228_v45 = vadd.f32 1.0, %v1184_v19  ;;  %v2835_v19 = vld [vmem:[#allocation54_spill] sm:$0xff] }
 0x1e4   :  { %v541_v6 = vpop.permute.xlu1 %540 }
 0x1e5   :  { %v545_v28 = vadd.f32 %v541_v6, %v2335_v54  ;;  %1191 = vrcp.f32 %v228_v45 }
 0x1e8   :  { %v631_v2 = vpop.permute.xlu1 %630 }
 0x1e9   :  { %v635_v5 = vadd.f32 %v631_v2, %v2344_v30 }
 0x1ec   :  { %v767_v18 = vpop.permute.xlu1 %766 }
 0x1ed   :  { %v771_v50 = vadd.f32 %v767_v18, %v2241_v42  ;;  %808 = vrot.lane.b32.xlu0 %v2259_v23, %s2764_s8  ;;  %v94_v42 = vmul.f32 %v2368_v16, %v2368_v16  ;;  %v634_v23 = vadd.f32 %v629_v15, %v608_v8  ;;  %v2413_v8 = vsub.f32 %v2409_v63, %v2834_v36 }
 0x1ee   :  { %v2425_v15 = vadd.f32 %v637_v53, %v635_v5 }
 0x1ef   :  { %v2358_v10 = vadd.f32 %v2290_v61, %v771_v50  ;;  %v547_v61 = vstv %s2362_s28  ;;  %v98_v12 = vsel %vm41_vm0, %v94_v42, 0.0  ;;  %v2383_v55 = vadd.f32 %v637_v53, %v634_v23 }
 0x1f0   :  { %v2378_v14 = vadd.f32 %v547_v61, %v544_v7  ;;  %v126_v59 = vmul.f32 %v2413_v8, %v2413_v8  ;;  %v2421_v35 = vadd.f32 %v547_v61, %v545_v28  ;;  %v721_v31 = vpop.permute.xlu1 %720  ;;  %v879_v54 = vsel %vm41_vm0, %v2425_v15, 0.0 }
 0x1f1   :  { %v876_v60 = vsel %vm41_vm0, %v2383_v55, 0.0  ;;  %v725_v21 = vadd.f32 %v721_v31, %v699_v22  ;;  %v1186_v22 = vpop.eup %1185  ;;  %v1091_v31 = vmul.f32 -1.442695, %v2303_v62 }
 0x1f2   :  { %v868_v3 = vsel %vm41_vm0, %v2378_v14, 0.0  ;;  %v130_v47 = vsel %vm41_vm0, %v126_v59, 0.0  ;;  %v871_v37 = vsel %vm41_vm0, %v2421_v35, 0.0  ;;  %v227_v6 = vadd.f32 1.0, %v1186_v22  ;;  %v1188_v2 = vpop.eup %1187 }
 0x1f3   :  { %v2429_v56 = vadd.f32 %v727_v38, %v725_v21  ;;  %v307_v18 = vadd.f32 1.0, %v1188_v2  ;;  %v1190_v50 = vpop.eup %1189 }
 0x1f4   :  { %1193 = vrcp.f32 %v227_v6  ;;  %v308_v29 = vadd.f32 1.0, %v1190_v50  ;;  %v1192_v40 = vpop.eup %1191  ;;  %v2836_v50 = vld [vmem:[#allocation52_spill] sm:$0xff] }
 0x1f5   :  { %v887_v30 = vsel %vm41_vm0, %v2429_v56, 0.0  ;;  %1195 = vrcp.f32 %v307_v18  ;;  %v234_v39 = vmul.f32 %v1192_v40, %v1192_v40  ;;  %v386_v18 = vstv %s1119_s29 }
 0x1f6   :  { %1197 = vrcp.f32 %v308_v29 }
 0x1f7   :  { %v336_v42 = vmul.f32 %v234_v39, %v234_v39 }
 0x1fe   :  { %v1194_v7 = vpop.eup %1193 }
 0x1ff   :  { %99 = vadd.xlane.f32.xlu1 %v98_v12  ;;  %v233_v24 = vmul.f32 %v1194_v7, %v1194_v7  ;;  %v1196_v23 = vpop.eup %1195  ;;  %v1090_v7 = vmul.f32 -1.442695, %v2306_v17  ;;  %v2838_v17 = vld [vmem:[#allocation58_spill] sm:$0xff] }
 0x200   :  { %v313_v32 = vmul.f32 %v1196_v23, %v1196_v23  ;;  %v1198_v38 = vpop.eup %1197  ;;  %v2837_v23 = vld [vmem:[#allocation57_spill] sm:$0xff] }
 0x201   :  { %v335_v26 = vmul.f32 %v233_v24, %v233_v24  ;;  %v314_v52 = vmul.f32 %v1198_v38, %v1198_v38  ;;  %v1105_v38 = vmul.f32 -1.442695, %v2313_v1 }
 0x203   :  { %869 = vadd.xlane.f32.xlu1 %v868_v3  ;;  %v376_v59 = vmul.f32 %v314_v52, %v314_v52 }
 0x207   :  { %877 = vadd.xlane.f32.xlu1 %v876_v60 }
 0x20b   :  { %885 = vadd.xlane.f32.xlu1 %v884_v20 }
 0x20c   :  { %96 = vadd.xlane.f32.xlu0 %v95_v11  ;;  %v375_v11 = vmul.f32 %v313_v32, %v313_v32 }
 0x210   :  { %128 = vadd.xlane.f32.xlu0 %v127_v34 }
 0x214   :  { %131 = vadd.xlane.f32.xlu0 %v130_v47 }
 0x218   :  { %872 = vadd.xlane.f32.xlu0 %v871_v37 }
 0x21c   :  { %880 = vadd.xlane.f32.xlu0 %v879_v54  ;;  %v346_v54 = vstv %s1115_s19 }
 0x220   :  { %888 = vadd.xlane.f32.xlu0 %v887_v30 }
 0x257   :  { %v120_v41 = vpop.xlane.xlu1 %119 }
 0x258   :  { %v122_v61 = vmul.f32 0.015625, %v120_v41 }
 0x25a   :  { %v338_v12 = vmul.f32 %v336_v42, %v122_v61  ;;  %v392_v42 = vstv %s1120_s4 }
 0x25b   :  { %v117_v13 = vpop.xlane.xlu0 %116 }
 0x25c   :  { %v340_v53 = vadd.f32 1e-05, %v338_v12  ;;  %v121_v3 = vmul.f32 0.015625, %v117_v13 }
 0x25e   :  { %1199 = vrsqrt.f32 %v340_v53  ;;  %v337_v60 = vmul.f32 %v335_v26, %v121_v3  ;;  %v1104_v26 = vmul.f32 -1.442695, %v2309_v27 }
 0x260   :  { %v149_v9 = vpop.xlane.xlu0 %148  ;;  %v339_v33 = vadd.f32 1e-05, %v337_v60 }
 0x261   :  { %v153_v20 = vmul.f32 0.015625, %v149_v9 }
 0x262   :  { %1201 = vrsqrt.f32 %v339_v33 }
 0x263   :  { %v377_v36 = vmul.f32 %v375_v11, %v153_v20 }
 0x264   :  { %v152_v28 = vpop.xlane.xlu0 %151 }
 0x265   :  { %v379_v34 = vadd.f32 1e-05, %v377_v36  ;;  %v154_v5 = vmul.f32 0.015625, %v152_v28 }
 0x267   :  { %1203 = vrsqrt.f32 %v379_v34  ;;  %v378_v47 = vmul.f32 %v376_v59, %v154_v5 }
 0x268   :  { %v1200_v21 = vpop.eup %1199 }
 0x269   :  { %v380_v37 = vadd.f32 1e-05, %v378_v47  ;;  %v344_v30 = vmul.f32 %v1200_v21, %v234_v39  ;;  %v809_v21 = vpop.permute.xlu0 %808 }
 0x26b   :  { %1205 = vrsqrt.f32 %v380_v37  ;;  %v348_v51 = vmul.f32 %v346_v54, %v344_v30 }
 0x26c   :  { %1207 = vpow2.f32 %v1091_v31  ;;  %v1202_v49 = vpop.eup %1201 }
 0x26d   :  { %v343_v43 = vmul.f32 %v1202_v49, %v233_v24  ;;  %v350_v45 = vmul.f32 %v348_v51, %v2835_v19  ;;  %1209 = vpow2.f32 %v1090_v7  ;;  %v814_v51 = vadd.f32 %v809_v21, %v2350_v44 }
 0x26e   :  { %1211 = vpow2.f32 %v1104_v26 }
 0x26f   :  { %v2439_v22 = vadd.f32 %v352_v58, %v350_v45  ;;  %v347_v6 = vmul.f32 %v346_v54, %v343_v43 }
 0x271   :  { %v1204_v2 = vpop.eup %1203  ;;  %832 = vrot.lane.b32.xlu0 %v2439_v22, %s2764_s8  ;;  %v349_v29 = vmul.f32 %v347_v6, %v2836_v50 }
 0x272   :  { %v383_v62 = vmul.f32 %v1204_v2, %v313_v32 }
 0x273   :  { %v2444_v40 = vadd.f32 %v352_v58, %v349_v29  ;;  %v817_v58 = vstv %s1172_s6 }
 0x274   :  { %v387_v39 = vmul.f32 %v386_v18, %v383_v62 }
 0x275   :  { %v1206_v41 = vpop.eup %1205  ;;  %830 = vrot.lane.b32.xlu1 %v2444_v40, %s2764_s8 }
 0x276   :  { %v1208_v61 = vpop.eup %1207  ;;  %v384_v24 = vmul.f32 %v1206_v41, %v314_v52  ;;  %v389_v12 = vmul.f32 %v387_v39, %v2837_v23  ;;  %v811_v52 = vpop.permute.xlu1 %810 }
 0x277   :  { %v188_v3 = vadd.f32 1.0, %v1208_v61  ;;  %v1210_v9 = vpop.eup %1209  ;;  %v815_v30 = vadd.f32 %v811_v52, %v2358_v10  ;;  %v2473_v10 = vadd.f32 %v817_v58, %v814_v51 }
 0x278   :  { %v2450_v13 = vadd.f32 %v392_v42, %v389_v12  ;;  %v388_v53 = vmul.f32 %v386_v18, %v384_v24  ;;  %v187_v33 = vadd.f32 1.0, %v1210_v9  ;;  %v1212_v11 = vpop.eup %1211 }
 0x279   :  { %1213 = vrcp.f32 %v188_v3  ;;  %v267_v36 = vadd.f32 1.0, %v1212_v11  ;;  %v2471_v18 = vadd.f32 %v817_v58, %v815_v30  ;;  %v892_v61 = vsel %vm41_vm0, %v2473_v10, 0.0 }
 0x27a   :  { %854 = vrot.lane.b32.xlu1 %v2450_v13, %s2764_s8  ;;  %v390_v32 = vmul.f32 %v388_v53, %v2838_v17  ;;  %1215 = vpow2.f32 %v1105_v38  ;;  %v326_v3 = vstv %s2467_s7  ;;  %v366_v58 = vstv %s1117_s12 }
 0x27b   :  { %1217 = vrcp.f32 %v187_v33  ;;  %v895_v41 = vsel %vm41_vm0, %v2471_v18, 0.0 }
 0x27c   :  { %v2457_v60 = vadd.f32 %v392_v42, %v390_v32  ;;  %1219 = vrcp.f32 %v267_v36 }
 0x27e   :  { %856 = vrot.lane.b32.xlu0 %v2457_v60, %s2764_s8 }
 0x283   :  { %v1214_v27 = vpop.eup %1213 }
 0x284   :  { %v1216_v20 = vpop.eup %1215  ;;  %v194_v28 = vmul.f32 %v1214_v27, %v1214_v27 }
 0x285   :  { %v268_v34 = vadd.f32 1.0, %v1216_v20  ;;  %v1218_v54 = vpop.eup %1217  ;;  %v332_v20 = vstv %s2475_s11 }
 0x286   :  { %v316_v1 = vmul.f32 %v194_v28, %v194_v28  ;;  %v193_v45 = vmul.f32 %v1218_v54, %v1218_v54  ;;  %v1220_v6 = vpop.eup %1219 }
 0x287   :  { %1221 = vrcp.f32 %v268_v34  ;;  %v273_v39 = vmul.f32 %v1220_v6, %v1220_v6 }
 0x288   :  { %v315_v44 = vmul.f32 %v193_v45, %v193_v45 }
 0x289   :  { %v355_v53 = vmul.f32 %v273_v39, %v273_v39 }
 0x28c   :  { %v100_v59 = vpop.xlane.xlu1 %99 }
 0x28d   :  { %v102_v5 = vmul.f32 0.015625, %v100_v59 }
 0x28f   :  { %v318_v47 = vmul.f32 %v316_v1, %v102_v5 }
 0x290   :  { %v870_v31 = vpop.xlane.xlu1 %869 }
 0x291   :  { %v320_v37 = vadd.f32 1e-05, %v318_v47  ;;  %v2463_v43 = vmul.f32 0.015625, %v870_v31  ;;  %v1222_v50 = vpop.eup %1221 }
 0x292   :  { %v274_v24 = vmul.f32 %v1222_v50, %v1222_v50 }
 0x293   :  { %1223 = vrsqrt.f32 %v320_v37 }
 0x294   :  { %v878_v49 = vpop.xlane.xlu1 %877  ;;  %v356_v11 = vmul.f32 %v274_v24, %v274_v24 }
 0x295   :  { %v2465_v19 = vmul.f32 0.015625, %v878_v49 }
 0x297   :  { %v946_v2 = vmax.f32 %v2463_v43, %v2465_v19 }
 0x299   :  { %v97_v62 = vpop.xlane.xlu0 %96 }
 0x29a   :  { %v101_v29 = vmul.f32 0.015625, %v97_v62 }
 0x29c   :  { %v317_v7 = vmul.f32 %v315_v44, %v101_v29 }
 0x29d   :  { %896 = vadd.xlane.f32.xlu0 %v895_v41  ;;  %v129_v42 = vpop.xlane.xlu0 %128  ;;  %v1224_v23 = vpop.eup %1223  ;;  %v372_v41 = vstv %s1118_s14 }
 0x29e   :  { %v319_v12 = vadd.f32 1e-05, %v317_v7  ;;  %v133_v26 = vmul.f32 0.015625, %v129_v42  ;;  %893 = vadd.xlane.f32.xlu1 %v892_v61  ;;  %v324_v17 = vmul.f32 %v1224_v23, %v194_v28 }
 0x2a0   :  { %1225 = vrsqrt.f32 %v319_v12  ;;  %v357_v32 = vmul.f32 %v355_v53, %v133_v26  ;;  %v328_v9 = vmul.f32 %v326_v3, %v324_v17 }
 0x2a1   :  { %v132_v38 = vpop.xlane.xlu0 %131 }
 0x2a2   :  { %v359_v33 = vadd.f32 1e-05, %v357_v32  ;;  %v134_v27 = vmul.f32 0.015625, %v132_v38  ;;  %v330_v52 = vmul.f32 %v328_v9, %v2368_v16 }
 0x2a4   :  { %1227 = vrsqrt.f32 %v359_v33  ;;  %v358_v36 = vmul.f32 %v356_v11, %v134_v27  ;;  %v2484_v59 = vadd.f32 %v332_v20, %v330_v52 }
 0x2a5   :  { %v873_v34 = vpop.xlane.xlu0 %872 }
 0x2a6   :  { %v360_v1 = vadd.f32 1e-05, %v358_v36  ;;  %v823_v28 = vsel %vm41_vm0, %v2484_v59, 0.0  ;;  %v875_v31 = vmul.f32 0.015625, %v873_v34 }
 0x2a7   :  { %824 = vadd.xlane.f32.xlu0 %v823_v28 }
 0x2a8   :  { %1229 = vrsqrt.f32 %v360_v1 }
 0x2a9   :  { %v881_v5 = vpop.xlane.xlu0 %880 }
 0x2aa   :  { %v1226_v47 = vpop.eup %1225  ;;  %v883_v21 = vmul.f32 0.015625, %v881_v5 }
 0x2ab   :  { %v323_v37 = vmul.f32 %v1226_v47, %v193_v45 }
 0x2ac   :  { %v947_v54 = vmax.f32 %v875_v31, %v883_v21 }
 0x2ad   :  { %v889_v16 = vpop.xlane.xlu0 %888  ;;  %v327_v30 = vmul.f32 %v326_v3, %v323_v37  ;;  %v886_v3 = vpop.xlane.xlu1 %885 }
 0x2ae   :  { %v1228_v51 = vpop.eup %1227  ;;  %v891_v49 = vmul.f32 0.015625, %v889_v16  ;;  %v890_v11 = vmul.f32 0.015625, %v886_v3 }
 0x2af   :  { %v329_v6 = vmul.f32 %v327_v30, %v2389_v46  ;;  %v363_v62 = vmul.f32 %v1228_v51, %v273_v39 }
 0x2b0   :  { %v949_v50 = vmax.f32 %v947_v54, %v891_v49  ;;  %v948_v36 = vmax.f32 %v946_v2, %v890_v11 }
 0x2b1   :  { %v2489_v44 = vadd.f32 %v332_v20, %v329_v6  ;;  %v367_v29 = vmul.f32 %v366_v58, %v363_v62 }
 0x2b2   :  { %v1230_v7 = vpop.eup %1229 }
 0x2b3   :  { %v820_v42 = vsel %vm41_vm0, %v2489_v44, 0.0  ;;  %v369_v45 = vmul.f32 %v367_v29, %v2402_v48  ;;  %v364_v61 = vmul.f32 %v1230_v7, %v274_v24 }
 0x2b4   :  { %821 = vadd.xlane.f32.xlu1 %v820_v42 }
 0x2b5   :  { %v2494_v23 = vadd.f32 %v372_v41, %v369_v45  ;;  %v368_v12 = vmul.f32 %v366_v58, %v364_v61 }
 0x2b7   :  { %v844_v46 = vsel %vm41_vm0, %v2494_v23, 0.0  ;;  %v370_v39 = vmul.f32 %v368_v12, %v2413_v8 }
 0x2b8   :  { %845 = vadd.xlane.f32.xlu1 %v844_v46 }
 0x2b9   :  { %v2499_v53 = vadd.f32 %v372_v41, %v370_v39 }
 0x2bb   :  { %v847_v26 = vsel %vm41_vm0, %v2499_v53, 0.0 }
 0x2bc   :  { %848 = vadd.xlane.f32.xlu0 %v847_v26 }
 0x2e3   :  { %v833_v17 = vpop.permute.xlu0 %832 }
 0x2e4   :  { %v839_v48 = vsel %vm41_vm0, %v833_v17, 0.0 }
 0x2e5   :  { %840 = vadd.xlane.f32.xlu0 %v839_v48 }
 0x2e7   :  { %v831_v24 = vpop.permute.xlu1 %830 }
 0x2e8   :  { %v836_v32 = vsel %vm41_vm0, %v831_v24, 0.0 }
 0x2e9   :  { %837 = vadd.xlane.f32.xlu1 %v836_v32 }
 0x2ec   :  { %v855_v38 = vpop.permute.xlu1 %854 }
 0x2ed   :  { %v860_v9 = vsel %vm41_vm0, %v855_v38, 0.0 }
 0x2ee   :  { %861 = vadd.xlane.f32.xlu1 %v860_v9 }
 0x2f0   :  { %v857_v8 = vpop.permute.xlu0 %856 }
 0x2f1   :  { %v863_v33 = vsel %vm41_vm0, %v857_v8, 0.0 }
 0x2f2   :  { %864 = vadd.xlane.f32.xlu0 %v863_v33 }
 0x32a   :  { %v897_v27 = vpop.xlane.xlu0 %896 }
 0x32b   :  { %v899_v20 = vmul.f32 0.015625, %v897_v27  ;;  %v894_v52 = vpop.xlane.xlu1 %893 }
 0x32c   :  { %v898_v34 = vmul.f32 0.015625, %v894_v52 }
 0x32d   :  { %v951_v1 = vmax.f32 %v949_v50, %v899_v20 }
 0x32e   :  { %v950_v28 = vmax.f32 %v948_v36, %v898_v34 }
 0x32f   :  { %v953_v5 = vsub.f32 %v875_v31, %v951_v1  ;;  %v959_v47 = vsub.f32 %v883_v21, %v951_v1  ;;  %v965_v37 = vsub.f32 %v891_v49, %v951_v1  ;;  %v971_v54 = vsub.f32 %v899_v20, %v951_v1 }
 0x330   :  { %v952_v16 = vsub.f32 %v2463_v43, %v950_v28  ;;  %v958_v30 = vsub.f32 %v2465_v19, %v950_v28  ;;  %v964_v29 = vsub.f32 %v890_v11, %v950_v28  ;;  %v970_v41 = vsub.f32 %v898_v34, %v950_v28 }
 0x331   :  { %v956_v51 = vmul.f32 1.442695, %v953_v5  ;;  %v962_v58 = vmul.f32 1.442695, %v959_v47  ;;  %v968_v6 = vmul.f32 1.442695, %v965_v37 }
 0x332   :  { %v974_v62 = vmul.f32 1.442695, %v971_v54  ;;  %v954_v7 = vmul.f32 1.442695, %v952_v16  ;;  %v960_v2 = vmul.f32 1.442695, %v958_v30 }
 0x333   :  { %1231 = vpow2.f32 %v956_v51  ;;  %v966_v31 = vmul.f32 1.442695, %v964_v29  ;;  %v972_v21 = vmul.f32 1.442695, %v970_v41 }
 0x334   :  { %1233 = vpow2.f32 %v962_v58 }
 0x335   :  { %1235 = vpow2.f32 %v968_v6 }
 0x336   :  { %1237 = vpow2.f32 %v974_v62 }
 0x337   :  { %1239 = vpow2.f32 %v954_v7 }
 0x338   :  { %1241 = vpow2.f32 %v960_v2 }
 0x339   :  { %1243 = vpow2.f32 %v966_v31 }
 0x33a   :  { %1245 = vpow2.f32 %v972_v21 }
 0x33d   :  { %v1232_v43 = vpop.eup %1231 }
 0x33e   :  { %v1234_v19 = vpop.eup %1233 }
 0x33f   :  { %v1236_v49 = vpop.eup %1235  ;;  %v977_v50 = vadd.f32 %v1234_v19, %v1232_v43 }
 0x340   :  { %v1238_v42 = vpop.eup %1237 }
 0x341   :  { %v1240_v45 = vpop.eup %1239  ;;  %v979_v61 = vadd.f32 %v1236_v49, %v977_v50  ;;  %v822_v5 = vpop.xlane.xlu1 %821 }
 0x342   :  { %v1242_v12 = vpop.eup %1241  ;;  %v826_v6 = vmul.f32 0.015625, %v822_v5 }
 0x343   :  { %v981_v46 = vadd.f32 %v1238_v42, %v979_v61  ;;  %v976_v39 = vadd.f32 %v1242_v12, %v1240_v45  ;;  %v1244_v26 = vpop.eup %1243 }
 0x344   :  { %v1246_v17 = vpop.eup %1245 }
 0x345   :  { %1247 = vrcp.f32 %v981_v46  ;;  %v978_v3 = vadd.f32 %v1244_v26, %v976_v39  ;;  %v846_v37 = vpop.xlane.xlu1 %845 }
 0x346   :  { %v850_v41 = vmul.f32 0.015625, %v846_v37 }
 0x347   :  { %v980_v48 = vadd.f32 %v1246_v17, %v978_v3 }
 0x349   :  { %1249 = vrcp.f32 %v980_v48 }
 0x34f   :  { %v1248_v24 = vpop.eup %1247 }
 0x350   :  { %v987_v32 = vmul.f32 %v1248_v24, %v1234_v19  ;;  %v991_v38 = vmul.f32 %v1248_v24, %v1238_v42  ;;  %v2512_v9 = vmul.f32 %v1248_v24, %v1232_v43  ;;  %v2514_v8 = vmul.f32 %v1248_v24, %v1236_v49 }
 0x352   :  { %v1001_v33 = vmul.f32 %v987_v32, %v2439_v22  ;;  %v1025_v28 = vmul.f32 %v991_v38, %v2457_v60  ;;  %v825_v22 = vpop.xlane.xlu0 %824 }
 0x353   :  { %v1250_v11 = vpop.eup %1249  ;;  %v827_v51 = vmul.f32 0.015625, %v825_v22 }
 0x354   :  { %1006 = vrot.lane.b32.xlu0 %v1001_v33, %s2764_s8  ;;  %v986_v27 = vmul.f32 %v1250_v11, %v1242_v12  ;;  %v990_v20 = vmul.f32 %v1250_v11, %v1246_v17  ;;  %v2518_v52 = vmul.f32 %v1250_v11, %v1240_v45  ;;  %v2520_v36 = vmul.f32 %v1250_v11, %v1244_v26 }
 0x356   :  { %v1000_v34 = vmul.f32 %v986_v27, %v2444_v40  ;;  %v1024_v1 = vmul.f32 %v990_v20, %v2450_v13  ;;  %v849_v47 = vpop.xlane.xlu0 %848 }
 0x357   :  { %v851_v29 = vmul.f32 0.015625, %v849_v47 }
 0x358   :  { %1004 = vrot.lane.b32.xlu1 %v1000_v34, %s2764_s8 }
 0x35c   :  { %1028 = vrot.lane.b32.xlu1 %v1024_v1, %s2764_s8 }
 0x360   :  { %1030 = vrot.lane.b32.xlu1 %v1025_v28, %s2764_s8 }
 0x372   :  { %v841_v54 = vpop.xlane.xlu0 %840 }
 0x373   :  { %v843_v30 = vmul.f32 0.015625, %v841_v54 }
 0x375   :  { %v901_v62 = vmax.f32 %v827_v51, %v843_v30 }
 0x376   :  { %v838_v16 = vpop.xlane.xlu1 %837 }
 0x377   :  { %v842_v58 = vmul.f32 0.015625, %v838_v16  ;;  %v903_v60 = vmax.f32 %v901_v62, %v851_v29 }
 0x379   :  { %v900_v13 = vmax.f32 %v826_v6, %v842_v58 }
 0x37b   :  { %v862_v2 = vpop.xlane.xlu1 %861  ;;  %v902_v31 = vmax.f32 %v900_v13, %v850_v41 }
 0x37c   :  { %v866_v21 = vmul.f32 0.015625, %v862_v2  ;;  %v995_v2 = vmul.f32 %v2512_v9, %v2484_v59 }
 0x37e   :  { %v904_v19 = vmax.f32 %v902_v31, %v866_v21 }
 0x37f   :  { %v865_v40 = vpop.xlane.xlu0 %864 }
 0x380   :  { %v867_v7 = vmul.f32 0.015625, %v865_v40  ;;  %v906_v42 = vsub.f32 %v826_v6, %v904_v19  ;;  %v912_v61 = vsub.f32 %v842_v58, %v904_v19  ;;  %v918_v3 = vsub.f32 %v850_v41, %v904_v19 }
 0x381   :  { %v924_v32 = vsub.f32 %v866_v21, %v904_v19 }
 0x382   :  { %v905_v43 = vmax.f32 %v903_v60, %v867_v7  ;;  %v908_v39 = vmul.f32 1.442695, %v906_v42  ;;  %v914_v26 = vmul.f32 1.442695, %v912_v61  ;;  %v920_v24 = vmul.f32 1.442695, %v918_v3 }
 0x383   :  { %v926_v27 = vmul.f32 1.442695, %v924_v32  ;;  %v1017_v42 = vmul.f32 %v2514_v8, %v2499_v53 }
 0x384   :  { %v907_v49 = vsub.f32 %v827_v51, %v905_v43  ;;  %v913_v50 = vsub.f32 %v843_v30, %v905_v43  ;;  %v919_v46 = vsub.f32 %v851_v29, %v905_v43  ;;  %v925_v48 = vsub.f32 %v867_v7, %v905_v43 }
 0x386   :  { %v910_v45 = vmul.f32 1.442695, %v907_v49  ;;  %v916_v12 = vmul.f32 1.442695, %v913_v50  ;;  %v922_v17 = vmul.f32 1.442695, %v919_v46 }
 0x387   :  { %v928_v38 = vmul.f32 1.442695, %v925_v48 }
 0x388   :  { %1251 = vpow2.f32 %v910_v45 }
 0x389   :  { %1253 = vpow2.f32 %v916_v12 }
 0x38a   :  { %1255 = vpow2.f32 %v908_v39  ;;  %v1016_v39 = vmul.f32 %v2520_v36, %v2494_v23 }
 0x38b   :  { %1257 = vpow2.f32 %v914_v26 }
 0x38c   :  { %1259 = vpow2.f32 %v922_v17 }
 0x38d   :  { %1261 = vpow2.f32 %v920_v24 }
 0x38e   :  { %1263 = vpow2.f32 %v928_v38 }
 0x38f   :  { %1265 = vpow2.f32 %v926_v27 }
 0x392   :  { %v1252_v33 = vpop.eup %1251 }
 0x393   :  { %v1254_v11 = vpop.eup %1253 }
 0x394   :  { %v1256_v20 = vpop.eup %1255  ;;  %v931_v34 = vadd.f32 %v1254_v11, %v1252_v33 }
 0x395   :  { %v1258_v1 = vpop.eup %1257 }
 0x396   :  { %v1260_v28 = vpop.eup %1259  ;;  %v930_v22 = vadd.f32 %v1258_v1, %v1256_v20 }
 0x397   :  { %v933_v5 = vadd.f32 %v1260_v28, %v931_v34  ;;  %v1262_v47 = vpop.eup %1261 }
 0x398   :  { %v1264_v37 = vpop.eup %1263  ;;  %v932_v54 = vadd.f32 %v1262_v47, %v930_v22 }
 0x399   :  { %v935_v16 = vadd.f32 %v1264_v37, %v933_v5  ;;  %v1266_v30 = vpop.eup %1265 }
 0x39a   :  { %v934_v51 = vadd.f32 %v1266_v30, %v932_v54 }
 0x39b   :  { %1267 = vrcp.f32 %v935_v16 }
 0x39c   :  { %1269 = vrcp.f32 %v934_v51 }
 0x3a5   :  { %v1268_v58 = vpop.eup %1267 }
 0x3a6   :  { %v939_v40 = vmul.f32 %v1268_v58, %v1252_v33  ;;  %v1270_v6 = vpop.eup %1269  ;;  %v941_v62 = vmul.f32 %v1268_v58, %v1254_v11  ;;  %v943_v29 = vmul.f32 %v1268_v58, %v1260_v28  ;;  %v945_v8 = vmul.f32 %v1268_v58, %v1264_v37 }
 0x3a7   :  { %v937_v7 = vmul.f32 %v1270_v6, %v1256_v20  ;;  %v940_v60 = vmul.f32 %v1270_v6, %v1258_v1  ;;  %v942_v31 = vmul.f32 %v1270_v6, %v1262_v47  ;;  %v944_v45 = vmul.f32 %v1270_v6, %v1266_v30 }
 0x3a8   :  { %v993_v13 = vmul.f32 %v939_v40, %v2421_v35  ;;  %v999_v41 = vmul.f32 %v941_v62, %v2425_v15  ;;  %v1015_v21 = vmul.f32 %v943_v29, %v2429_v56  ;;  %v994_v35 = vmul.f32 %v2518_v52, %v2489_v44 }
 0x3a9   :  { %v992_v50 = vmul.f32 %v937_v7, %v2378_v14  ;;  %v998_v59 = vmul.f32 %v940_v60, %v2383_v55  ;;  %v1014_v15 = vmul.f32 %v942_v31, %v2396_v0  ;;  %v1022_v53 = vmul.f32 %v944_v45, %v2473_v10 }
 0x3aa   :  { %v997_v19 = vadd.f32 %v995_v2, %v993_v13  ;;  %v1019_v9 = vadd.f32 %v1017_v42, %v1015_v21  ;;  %v1023_v55 = vmul.f32 %v945_v8, %v2471_v18 }
 0x3ab   :  { %v996_v56 = vadd.f32 %v994_v35, %v992_v50  ;;  %v1018_v3 = vadd.f32 %v1016_v39, %v1014_v15 }
 0x3c6   :  { %v1007_v43 = vpop.permute.xlu0 %1006 }
 0x3c7   :  { %v1011_v49 = vadd.f32 %v1007_v43, %v999_v41 }
 0x3c9   :  { %v1013_v61 = vadd.f32 %v1011_v49, %v997_v19 }
 0x3ca   :  { %v1005_v12 = vpop.permute.xlu1 %1004 }
 0x3cb   :  { %v1010_v46 = vadd.f32 %v1005_v12, %v998_v59  ;;  %v1021_v14 = vadd.f32 %v1019_v9, %v1013_v61 }
 0x3cd   :  { %v1012_v26 = vadd.f32 %v1010_v46, %v996_v56 }
 0x3ce   :  { %v1029_v44 = vpop.permute.xlu1 %1028 }
 0x3cf   :  { %v1020_v52 = vadd.f32 %v1018_v3, %v1012_v26  ;;  %v1034_v17 = vadd.f32 %v1029_v44, %v1022_v53 }
 0x3d1   :  { %v1036_v48 = vadd.f32 %v1034_v17, %v1020_v52 }
 0x3d2   :  { %v1031_v0 = vpop.permute.xlu1 %1030 }
 0x3d3   :  { %v1173_v24 = vmul.f32 -1.442695, %v1036_v48  ;;  %v1035_v32 = vadd.f32 %v1031_v0, %v1023_v55 }
 0x3d5   :  { %1271 = vpow2.f32 %v1173_v24  ;;  %v1037_v38 = vadd.f32 %v1035_v32, %v1021_v14 }
 0x3d7   :  { %v1174_v33 = vmul.f32 -1.442695, %v1037_v38 }
 0x3d9   :  { %1273 = vpow2.f32 %v1174_v33 }
 0x3df   :  { %v1272_v23 = vpop.eup %1271 }
 0x3e0   :  { %v1044_v36 = vadd.f32 1.0, %v1272_v23 }
 0x3e2   :  { %1275 = vrcp.f32 %v1044_v36 }
 0x3e3   :  { %v1274_v11 = vpop.eup %1273 }
 0x3e4   :  { %v1045_v27 = vadd.f32 1.0, %v1274_v11 }
 0x3e6   :  { %1277 = vrcp.f32 %v1045_v27 }
 0x3ec   :  { %v1276_v10 = vpop.eup %1275 }
 0x3ed   :  { %1052 = vrot.lane.b32.xlu0 %v1276_v10, %s2764_s8 }
 0x3f0   :  { %v1278_v20 = vpop.eup %1277 }
 0x3f1   :  { %1054 = vrot.lane.b32.xlu1 %v1278_v20, %s2764_s8 }
 0x45f   :  { %v1053_v18 = vpop.permute.xlu0 %1052 }
 0x460   :  { %v1058_v34 = vsel %vm41_vm0, %v1276_v10, %v1053_v18 }
 0x461   :  { %v1060_v1 = vmul.f32 %v2385_v57, %v1058_v34  ;;  %v1061_v28 = vmul.f32 %v2398_v25, %v1058_v34 }
 0x463   :  { %1064 = vst [vmem:[#allocation7] sm:$0xff] %v1060_v1  ;;  %1065 = vst [vmem:[#allocation7 + $0x8] sm:$0xff] %v1061_v28  ;;  %v1055_v22 = vpop.permute.xlu1 %1054 }
 0x464   :  { %v1059_v5 = vsel %vm41_vm0, %v1278_v20, %v1055_v22 }
 0x465   :  { %v1062_v47 = vmul.f32 %v2364_v4, %v1059_v5  ;;  %v1063_v37 = vmul.f32 %v2409_v63, %v1059_v5 }
 0x467   :  { %1066 = vst [vmem:[#allocation7 + $0x10] sm:$0xff] %v1062_v47  ;;  %1067 = vst [vmem:[#allocation7 + $0x18] sm:$0xff] %v1063_v37 }
 0x468   :  { %1326 = shalt.err (!%p1323_p1)
}
 0x469   :  { %s2839_s23 = sld [smem:[#allocation63_spill]] }
 0x46f   :  { %s1327_s24 = scalar_lea.hbm %s2839_s23, 512 }
 0x470   :  { %p1328_p2 = scmp.ne.s32.totalorder %s2839_s23, %s1327_s24  ;;  %p1331_p3 = scmp.lt.u32.totalorder %s1327_s24, %s2839_s23 }
 0x472   :  { %p1333_p4 = pnand %p1331_p3, %p1328_p2 }
 0x474   :  { %1336 = shalt.err (!%p1333_p4)
}
 0x475   :  { %s2840_s20 = smov 16   ;;  %s2841_s10 = smov 256  }
 0x476   :  { %1079 = dma.vmem_to_hbm [thread:$0]  %s1074_s17, 512, %s2839_s23, [#allocation4], %s2841_s10, %s2841_s10, %s2840_s20  }
 0x477   :  { %1341 = dma.done.wait [#allocation4], 512  }
 0x478   :  { %1342 = vsyncadd [#allocation4], 4294966784 }
 0x479   :  { %1083 = vsyncpa [#allocation3], 1 }
 0x47a   :  { %1084 = vsyncpa [#allocation4], 1 }
 0x47b   :  { %1085 = vsyncpa [#allocation5], 1 }

</bundles_post_ra>
